<compile_context>
chip_gen: v7x
topology: tpu7x:2x2x1
jax: 0.10.0
libtpu: 0.0.40
codegen_flags: <defaults>
</compile_context>

<pallas_src>
import functools

import jax
import jax.numpy as jnp
from jax.experimental import pallas as pl
from jax.experimental.pallas import tpu as pltpu

NUM_BITS = 512
NUM_ON_BITS = 10
_NEG_LARGE = -3.0e38  # plain Python float -> literal; representable in bf16 too


def _round_up(a, b):
    return ((a + b - 1) // b) * b


def _fc_kwta_kernel(x_ref, w_ref, b_ref, o_ref, out_s, masked_s, *, k):
    # ---- Linear layer on the MXU: (TB, N) @ (N, N) + (1, N); f32 accumulation.
    # Staged once into `out_s` in the selection dtype (bf16 on v6e/v7x).
    out_s[...] = (
        jnp.dot(x_ref[...], w_ref[...], preferred_element_type=jnp.float32)
        + b_ref[...]
    ).astype(out_s.dtype)

    # ---- k-th largest value per row (duplicates counted, ties included).
    # Walk the distinct maxima in descending order carrying a `masked` copy in
    # VMEM; the cumulative count of removed elements grows by >= 1 per pass,
    # so k passes always suffice.  `count` / `topval` updates are (rows, 1)
    # narrow ops; only the max / eq / sum / select run at full tile width.
    count = 0
    topval = _NEG_LARGE
    for p in range(k):  # k = numOnBits is small and static -> unrolled
        vals = out_s[...] if p == 0 else masked_s[...]
        m = jnp.max(vals, axis=-1, keepdims=True)
        eq = vals == m
        count = count + jnp.sum(eq.astype(jnp.int32), axis=-1, keepdims=True)
        # m decreases monotonically across passes; the running max keeps the
        # first (largest) distinct value whose cumulative count reaches k.
        topval = jnp.maximum(topval, jnp.where(count >= k, m, _NEG_LARGE))
        if p + 1 < k:  # the last pass's masked copy is never read
            masked_s[...] = jnp.where(eq, _NEG_LARGE, vals)

    o_ref[...] = (out_s[...] >= topval).astype(o_ref.dtype)


def _default_select_dtype():
    """bf16 selection on chips with a bf16 VPU path (v6e / v7x); f32 otherwise."""
    try:
        kind = jax.devices()[0].device_kind.lower()
    except Exception:
        return jnp.float32
    if any(g in kind for g in ("v2", "v3", "v4", "v5")):
        return jnp.float32
    return jnp.bfloat16


def _choose_block_rows(B, min_rows):
    # Prefer a divisor of B (avoids an extra HBM round trip padding x) that
    # still leaves >= 2 grid steps so the single "parallel" axis splits across
    # v7x's two TensorCores; cap at 512 rows (VMEM use is a few MiB at N=512).
    single = None
    for cand in (512, 256, 128, 64, 32, 16):
        if cand < min_rows or cand > B or B % cand:
            continue
        if B // cand >= 2:
            return cand
        if single is None:
            single = cand
    if single is not None:
        return single
    # No clean divisor: pad the tail instead (cheap at the sizes involved).
    if B > 512:
        return max(min_rows, min(512, _round_up(pl.cdiv(B, 2), min_rows)))
    return max(min_rows, min(512, _round_up(B, min_rows)))


def fc_kwta(x, w_t, b, *, num_on_bits=NUM_ON_BITS, block_rows=None,
            use_bf16_matmul=True, select_dtype=None):
    """x: (B, N) f32, w_t: (N, N) f32 (already transposed, (in, out)), b: (N,) f32."""
    B, N = x.shape
    assert w_t.shape == (N, N) and b.shape == (N,)

    dot_dtype = jnp.bfloat16 if use_bf16_matmul else jnp.float32
    if not use_bf16_matmul:
        select_dtype = jnp.float32  # exact path: keep selection exact too
    elif select_dtype is None:
        select_dtype = _default_select_dtype()

    min_rows = 16 if dot_dtype == jnp.bfloat16 else 8
    if block_rows is None:
        block_rows = _choose_block_rows(B, min_rows)

    # Pad only when no clean divisor was available (padded rows sliced off).
    B_pad = _round_up(B, block_rows)
    if B_pad != B:
        x = jnp.pad(x, ((0, B_pad - B), (0, 0)))

    x_in = x.astype(dot_dtype)
    w_in = w_t.astype(dot_dtype)
    b2d = b.reshape(1, N).astype(jnp.float32)

    kernel = functools.partial(_fc_kwta_kernel, k=num_on_bits)

    itemsize = jnp.dtype(dot_dtype).itemsize
    cost = pl.CostEstimate(
        flops=2 * B_pad * N * N,
        transcendentals=0,
        bytes_accessed=(B_pad * N * itemsize        # x
                        + N * N * itemsize          # weight
                        + N * 4                     # bias
                        + B_pad * N * 4),           # output mask (f32)
    )

    out = pl.pallas_call(
        kernel,
        out_shape=jax.ShapeDtypeStruct((B_pad, N), jnp.float32),
        grid_spec=pltpu.PrefetchScalarGridSpec(
            num_scalar_prefetch=0,
            grid=(B_pad // block_rows,),
            in_specs=[
                pl.BlockSpec((block_rows, N), lambda i: (i, 0)),  # x rows
                # Constant index maps -> weight/bias effectively VMEM-resident
                # across grid steps (bf16 weight is only 0.5 MiB at N=512).
                pl.BlockSpec((N, N), lambda i: (0, 0)),           # full weight
                pl.BlockSpec((1, N), lambda i: (0, 0)),           # bias
            ],
            out_specs=pl.BlockSpec((block_rows, N), lambda i: (i, 0)),
            # Linear output + carried `masked` copy live in VMEM scratch: the
            # tile is far larger than the 64-vreg file at these block sizes,
            # so a register-resident variant would only spill.
            scratch_shapes=[pltpu.VMEM((block_rows, N), select_dtype),
                            pltpu.VMEM((block_rows, N), select_dtype)],
        ),
        compiler_params=pltpu.CompilerParams(
            dimension_semantics=("parallel",),
        ),
        cost_estimate=cost,
    )(x_in, w_in, b2d)

    return out[:B] if B_pad != B else out


if __name__ == "__main__":
    key = jax.random.PRNGKey(0)
    kx, kw, kb = jax.random.split(key, 3)

    B = 8
    N = NUM_BITS
    # Deterministic init mimicking nn.Linear: U(-1/sqrt(in), 1/sqrt(in)).
    bound = 1.0 / float(N) ** 0.5
    weight = jax.random.uniform(kw, (N, N), jnp.float32, -bound, bound)  # (out, in)
    bias = jax.random.uniform(kb, (N,), jnp.float32, -bound, bound)
    x = jax.random.normal(kx, (B, N), jnp.float32)

    w_t = weight.T  # kernel expects (in, out)

    # Fast path: bf16 MXU inputs (f32 accumulation), bf16 selection on v6e/v7x.
    comp = jax.block_until_ready(fc_kwta(x, w_t, bias))
    # Exact f32 path for the semantic check against the PyTorch definition.
    comp_exact = jax.block_until_ready(fc_kwta(x, w_t, bias, use_bf16_matmul=False))

    # Pure-JAX reference of the module's forward.
    out_ref = jnp.dot(x, w_t) + bias
    kth = -jnp.sort(-out_ref, axis=1)[:, NUM_ON_BITS - 1]
    ref_comp = (out_ref >= kth[:, None]).astype(jnp.float32)

    assert comp.shape == (B, N) and comp.dtype == jnp.float32
    assert bool(jnp.all(jnp.sum(comp, axis=1) >= NUM_ON_BITS))
    assert bool(jnp.all(jnp.sum(comp_exact, axis=1) >= NUM_ON_BITS))
    # f32 path should match the reference (tiny tolerance for float-tie noise).
    agree_exact = float(jnp.mean((comp_exact == ref_comp).astype(jnp.float32)))
    assert agree_exact >= 0.999, agree_exact
    # bf16 matmul / bf16 selection may flip a few entries right at the k-th
    # threshold (near-ties collapse in bf16); semantics otherwise identical.
    agree_fast = float(jnp.mean((comp == ref_comp).astype(jnp.float32)))
    assert agree_fast >= 0.97, agree_fast

    print("KERNEL_OK")
</pallas_src>

<mosaic_0001>
module attributes {stable_mosaic.version = 11 : i64} {
  func.func @_fc_kwta_kernel(%arg0: i32, %arg1: memref<16x512xbf16, #tpu.memory_space<vmem>>, %arg2: memref<512x512xbf16, #tpu.memory_space<vmem>>, %arg3: memref<1x512xf32, #tpu.memory_space<vmem>>, %arg4: memref<16x512xf32, #tpu.memory_space<vmem>>, %arg5: memref<16x512xbf16, #tpu.memory_space<vmem>>, %arg6: memref<16x512xbf16, #tpu.memory_space<vmem>>) attributes {dimension_semantics = [#tpu.dimension_semantics<parallel>], iteration_bounds = array<i64: 1>, scalar_prefetch = 0 : i64, scratch_operands = 2 : i64, tpu.core_type = #tpu.core_type<tc>, window_params = [{transform_indices = @transform_0, window_bounds = array<i64: 16, 512>}, {pipeline_mode = #tpu.pipeline_mode<synchronous>, transform_indices = @transform_1, window_bounds = array<i64: 512, 512>}, {pipeline_mode = #tpu.pipeline_mode<synchronous>, transform_indices = @transform_2, window_bounds = array<i64: 1, 512>}, {transform_indices = @transform_3, window_bounds = array<i64: 16, 512>}]} {
    %c0 = arith.constant 0 : index
    %c0_0 = arith.constant 0 : index
    %0 = vector.load %arg1[%c0, %c0_0] : memref<16x512xbf16, #tpu.memory_space<vmem>>, vector<16x512xbf16>
    %c0_1 = arith.constant 0 : index
    %c0_2 = arith.constant 0 : index
    %1 = vector.load %arg2[%c0_1, %c0_2] : memref<512x512xbf16, #tpu.memory_space<vmem>>, vector<512x512xbf16>
    %cst = arith.constant dense<0.000000e+00> : vector<16x512xf32>
    %2 = tpu.matmul %0, %1, %cst {dimension_numbers = #tpu.dot_dimension_numbers<[1], [0], [0], [1], [0, 0, 1, 1], [], []>} : vector<16x512xbf16>, vector<512x512xbf16>, vector<16x512xf32> -> vector<16x512xf32>
    %c0_3 = arith.constant 0 : index
    %c0_4 = arith.constant 0 : index
    %3 = vector.load %arg3[%c0_3, %c0_4] : memref<1x512xf32, #tpu.memory_space<vmem>>, vector<1x512xf32>
    %4 = vector.broadcast %3 : vector<1x512xf32> to vector<16x512xf32>
    %5 = arith.addf %2, %4 : vector<16x512xf32>
    %6 = arith.truncf %5 : vector<16x512xf32> to vector<16x512xbf16>
    %c0_5 = arith.constant 0 : index
    %c0_6 = arith.constant 0 : index
    %7 = vector.load %arg5[%c0_5, %c0_6] : memref<16x512xbf16, #tpu.memory_space<vmem>>, vector<16x512xbf16>
    tpu.vector_store %arg5[%c0_5, %c0_6], %6 {strides = array<i32>} : memref<16x512xbf16, #tpu.memory_space<vmem>>, vector<16x512xbf16>,
    %c0_7 = arith.constant 0 : index
    %c0_8 = arith.constant 0 : index
    %8 = vector.load %arg5[%c0_7, %c0_8] : memref<16x512xbf16, #tpu.memory_space<vmem>>, vector<16x512xbf16>
    %cst_9 = arith.constant dense<0xFF80> : vector<16xbf16>
    %9 = vector.multi_reduction <maximumf>, %8, %cst_9 [1] : vector<16x512xbf16> to vector<16xbf16>
    %10 = vector.shape_cast %9 : vector<16xbf16> to vector<16x1xbf16>
    %11 = vector.broadcast %10 : vector<16x1xbf16> to vector<16x512xbf16>
    %12 = arith.cmpf oeq, %8, %11 : vector<16x512xbf16>
    %13 = arith.extui %12 : vector<16x512xi1> to vector<16x512xi32>
    %cst_10 = arith.constant dense<0> : vector<16xi32>
    %14 = vector.multi_reduction <add>, %13, %cst_10 [1] : vector<16x512xi32> to vector<16xi32>
    %15 = vector.shape_cast %14 : vector<16xi32> to vector<16x1xi32>
    %c0_i32 = arith.constant 0 : i32
    %16 = vector.broadcast %c0_i32 : i32 to vector<16x1xi32>
    %17 = arith.addi %16, %15 : vector<16x1xi32>
    %c10_i32 = arith.constant 10 : i32
    %18 = vector.broadcast %c10_i32 : i32 to vector<16x1xi32>
    %19 = arith.cmpi sge, %17, %18 : vector<16x1xi32>
    %cst_11 = arith.constant -3.000000e+38 : f32
    %20 = arith.truncf %cst_11 : f32 to bf16
    %21 = vector.broadcast %20 : bf16 to vector<16x1xbf16>
    %22 = arith.select %19, %10, %21 : vector<16x1xi1>, vector<16x1xbf16>
    %cst_12 = arith.constant -3.004060e+38 : bf16
    %23 = vector.broadcast %cst_12 : bf16 to vector<16x1xbf16>
    %24 = arith.maximumf %23, %22 : vector<16x1xbf16>
    %cst_13 = arith.constant -3.000000e+38 : f32
    %25 = arith.truncf %cst_13 : f32 to bf16
    %26 = vector.broadcast %25 : bf16 to vector<16x512xbf16>
    %27 = arith.select %12, %26, %8 : vector<16x512xi1>, vector<16x512xbf16>
    %c0_14 = arith.constant 0 : index
    %c0_15 = arith.constant 0 : index
    %28 = vector.load %arg6[%c0_14, %c0_15] : memref<16x512xbf16, #tpu.memory_space<vmem>>, vector<16x512xbf16>
    tpu.vector_store %arg6[%c0_14, %c0_15], %27 {strides = array<i32>} : memref<16x512xbf16, #tpu.memory_space<vmem>>, vector<16x512xbf16>,
    %c0_16 = arith.constant 0 : index
    %c0_17 = arith.constant 0 : index
    %29 = vector.load %arg6[%c0_16, %c0_17] : memref<16x512xbf16, #tpu.memory_space<vmem>>, vector<16x512xbf16>
    %cst_18 = arith.constant dense<0xFF80> : vector<16xbf16>
    %30 = vector.multi_reduction <maximumf>, %29, %cst_18 [1] : vector<16x512xbf16> to vector<16xbf16>
    %31 = vector.shape_cast %30 : vector<16xbf16> to vector<16x1xbf16>
    %32 = vector.broadcast %31 : vector<16x1xbf16> to vector<16x512xbf16>
    %33 = arith.cmpf oeq, %29, %32 : vector<16x512xbf16>
    %34 = arith.extui %33 : vector<16x512xi1> to vector<16x512xi32>
    %cst_19 = arith.constant dense<0> : vector<16xi32>
    %35 = vector.multi_reduction <add>, %34, %cst_19 [1] : vector<16x512xi32> to vector<16xi32>
    %36 = vector.shape_cast %35 : vector<16xi32> to vector<16x1xi32>
    %37 = arith.addi %17, %36 : vector<16x1xi32>
    %c10_i32_20 = arith.constant 10 : i32
    %38 = vector.broadcast %c10_i32_20 : i32 to vector<16x1xi32>
    %39 = arith.cmpi sge, %37, %38 : vector<16x1xi32>
    %cst_21 = arith.constant -3.000000e+38 : f32
    %40 = arith.truncf %cst_21 : f32 to bf16
    %41 = vector.broadcast %40 : bf16 to vector<16x1xbf16>
    %42 = arith.select %39, %31, %41 : vector<16x1xi1>, vector<16x1xbf16>
    %43 = arith.maximumf %24, %42 : vector<16x1xbf16>
    %cst_22 = arith.constant -3.000000e+38 : f32
    %44 = arith.truncf %cst_22 : f32 to bf16
    %45 = vector.broadcast %44 : bf16 to vector<16x512xbf16>
    %46 = arith.select %33, %45, %29 : vector<16x512xi1>, vector<16x512xbf16>
    %c0_23 = arith.constant 0 : index
    %c0_24 = arith.constant 0 : index
    %47 = vector.load %arg6[%c0_23, %c0_24] : memref<16x512xbf16, #tpu.memory_space<vmem>>, vector<16x512xbf16>
    tpu.vector_store %arg6[%c0_23, %c0_24], %46 {strides = array<i32>} : memref<16x512xbf16, #tpu.memory_space<vmem>>, vector<16x512xbf16>,
    %c0_25 = arith.constant 0 : index
    %c0_26 = arith.constant 0 : index
    %48 = vector.load %arg6[%c0_25, %c0_26] : memref<16x512xbf16, #tpu.memory_space<vmem>>, vector<16x512xbf16>
    %cst_27 = arith.constant dense<0xFF80> : vector<16xbf16>
    %49 = vector.multi_reduction <maximumf>, %48, %cst_27 [1] : vector<16x512xbf16> to vector<16xbf16>
    %50 = vector.shape_cast %49 : vector<16xbf16> to vector<16x1xbf16>
    %51 = vector.broadcast %50 : vector<16x1xbf16> to vector<16x512xbf16>
    %52 = arith.cmpf oeq, %48, %51 : vector<16x512xbf16>
    %53 = arith.extui %52 : vector<16x512xi1> to vector<16x512xi32>
    %cst_28 = arith.constant dense<0> : vector<16xi32>
    %54 = vector.multi_reduction <add>, %53, %cst_28 [1] : vector<16x512xi32> to vector<16xi32>
    %55 = vector.shape_cast %54 : vector<16xi32> to vector<16x1xi32>
    %56 = arith.addi %37, %55 : vector<16x1xi32>
    %c10_i32_29 = arith.constant 10 : i32
    %57 = vector.broadcast %c10_i32_29 : i32 to vector<16x1xi32>
    %58 = arith.cmpi sge, %56, %57 : vector<16x1xi32>
    %cst_30 = arith.constant -3.000000e+38 : f32
    %59 = arith.truncf %cst_30 : f32 to bf16
    %60 = vector.broadcast %59 : bf16 to vector<16x1xbf16>
    %61 = arith.select %58, %50, %60 : vector<16x1xi1>, vector<16x1xbf16>
    %62 = arith.maximumf %43, %61 : vector<16x1xbf16>
    %cst_31 = arith.constant -3.000000e+38 : f32
    %63 = arith.truncf %cst_31 : f32 to bf16
    %64 = vector.broadcast %63 : bf16 to vector<16x512xbf16>
    %65 = arith.select %52, %64, %48 : vector<16x512xi1>, vector<16x512xbf16>
    %c0_32 = arith.constant 0 : index
    %c0_33 = arith.constant 0 : index
    %66 = vector.load %arg6[%c0_32, %c0_33] : memref<16x512xbf16, #tpu.memory_space<vmem>>, vector<16x512xbf16>
    tpu.vector_store %arg6[%c0_32, %c0_33], %65 {strides = array<i32>} : memref<16x512xbf16, #tpu.memory_space<vmem>>, vector<16x512xbf16>,
    %c0_34 = arith.constant 0 : index
    %c0_35 = arith.constant 0 : index
    %67 = vector.load %arg6[%c0_34, %c0_35] : memref<16x512xbf16, #tpu.memory_space<vmem>>, vector<16x512xbf16>
    %cst_36 = arith.constant dense<0xFF80> : vector<16xbf16>
    %68 = vector.multi_reduction <maximumf>, %67, %cst_36 [1] : vector<16x512xbf16> to vector<16xbf16>
    %69 = vector.shape_cast %68 : vector<16xbf16> to vector<16x1xbf16>
    %70 = vector.broadcast %69 : vector<16x1xbf16> to vector<16x512xbf16>
    %71 = arith.cmpf oeq, %67, %70 : vector<16x512xbf16>
    %72 = arith.extui %71 : vector<16x512xi1> to vector<16x512xi32>
    %cst_37 = arith.constant dense<0> : vector<16xi32>
    %73 = vector.multi_reduction <add>, %72, %cst_37 [1] : vector<16x512xi32> to vector<16xi32>
    %74 = vector.shape_cast %73 : vector<16xi32> to vector<16x1xi32>
    %75 = arith.addi %56, %74 : vector<16x1xi32>
    %c10_i32_38 = arith.constant 10 : i32
    %76 = vector.broadcast %c10_i32_38 : i32 to vector<16x1xi32>
    %77 = arith.cmpi sge, %75, %76 : vector<16x1xi32>
    %cst_39 = arith.constant -3.000000e+38 : f32
    %78 = arith.truncf %cst_39 : f32 to bf16
    %79 = vector.broadcast %78 : bf16 to vector<16x1xbf16>
    %80 = arith.select %77, %69, %79 : vector<16x1xi1>, vector<16x1xbf16>
    %81 = arith.maximumf %62, %80 : vector<16x1xbf16>
    %cst_40 = arith.constant -3.000000e+38 : f32
    %82 = arith.truncf %cst_40 : f32 to bf16
    %83 = vector.broadcast %82 : bf16 to vector<16x512xbf16>
    %84 = arith.select %71, %83, %67 : vector<16x512xi1>, vector<16x512xbf16>
    %c0_41 = arith.constant 0 : index
    %c0_42 = arith.constant 0 : index
    %85 = vector.load %arg6[%c0_41, %c0_42] : memref<16x512xbf16, #tpu.memory_space<vmem>>, vector<16x512xbf16>
    tpu.vector_store %arg6[%c0_41, %c0_42], %84 {strides = array<i32>} : memref<16x512xbf16, #tpu.memory_space<vmem>>, vector<16x512xbf16>,
    %c0_43 = arith.constant 0 : index
    %c0_44 = arith.constant 0 : index
    %86 = vector.load %arg6[%c0_43, %c0_44] : memref<16x512xbf16, #tpu.memory_space<vmem>>, vector<16x512xbf16>
    %cst_45 = arith.constant dense<0xFF80> : vector<16xbf16>
    %87 = vector.multi_reduction <maximumf>, %86, %cst_45 [1] : vector<16x512xbf16> to vector<16xbf16>
    %88 = vector.shape_cast %87 : vector<16xbf16> to vector<16x1xbf16>
    %89 = vector.broadcast %88 : vector<16x1xbf16> to vector<16x512xbf16>
    %90 = arith.cmpf oeq, %86, %89 : vector<16x512xbf16>
    %91 = arith.extui %90 : vector<16x512xi1> to vector<16x512xi32>
    %cst_46 = arith.constant dense<0> : vector<16xi32>
    %92 = vector.multi_reduction <add>, %91, %cst_46 [1] : vector<16x512xi32> to vector<16xi32>
    %93 = vector.shape_cast %92 : vector<16xi32> to vector<16x1xi32>
    %94 = arith.addi %75, %93 : vector<16x1xi32>
    %c10_i32_47 = arith.constant 10 : i32
    %95 = vector.broadcast %c10_i32_47 : i32 to vector<16x1xi32>
    %96 = arith.cmpi sge, %94, %95 : vector<16x1xi32>
    %cst_48 = arith.constant -3.000000e+38 : f32
    %97 = arith.truncf %cst_48 : f32 to bf16
    %98 = vector.broadcast %97 : bf16 to vector<16x1xbf16>
    %99 = arith.select %96, %88, %98 : vector<16x1xi1>, vector<16x1xbf16>
    %100 = arith.maximumf %81, %99 : vector<16x1xbf16>
    %cst_49 = arith.constant -3.000000e+38 : f32
    %101 = arith.truncf %cst_49 : f32 to bf16
    %102 = vector.broadcast %101 : bf16 to vector<16x512xbf16>
    %103 = arith.select %90, %102, %86 : vector<16x512xi1>, vector<16x512xbf16>
    %c0_50 = arith.constant 0 : index
    %c0_51 = arith.constant 0 : index
    %104 = vector.load %arg6[%c0_50, %c0_51] : memref<16x512xbf16, #tpu.memory_space<vmem>>, vector<16x512xbf16>
    tpu.vector_store %arg6[%c0_50, %c0_51], %103 {strides = array<i32>} : memref<16x512xbf16, #tpu.memory_space<vmem>>, vector<16x512xbf16>,
    %c0_52 = arith.constant 0 : index
    %c0_53 = arith.constant 0 : index
    %105 = vector.load %arg6[%c0_52, %c0_53] : memref<16x512xbf16, #tpu.memory_space<vmem>>, vector<16x512xbf16>
    %cst_54 = arith.constant dense<0xFF80> : vector<16xbf16>
    %106 = vector.multi_reduction <maximumf>, %105, %cst_54 [1] : vector<16x512xbf16> to vector<16xbf16>
    %107 = vector.shape_cast %106 : vector<16xbf16> to vector<16x1xbf16>
    %108 = vector.broadcast %107 : vector<16x1xbf16> to vector<16x512xbf16>
    %109 = arith.cmpf oeq, %105, %108 : vector<16x512xbf16>
    %110 = arith.extui %109 : vector<16x512xi1> to vector<16x512xi32>
    %cst_55 = arith.constant dense<0> : vector<16xi32>
    %111 = vector.multi_reduction <add>, %110, %cst_55 [1] : vector<16x512xi32> to vector<16xi32>
    %112 = vector.shape_cast %111 : vector<16xi32> to vector<16x1xi32>
    %113 = arith.addi %94, %112 : vector<16x1xi32>
    %c10_i32_56 = arith.constant 10 : i32
    %114 = vector.broadcast %c10_i32_56 : i32 to vector<16x1xi32>
    %115 = arith.cmpi sge, %113, %114 : vector<16x1xi32>
    %cst_57 = arith.constant -3.000000e+38 : f32
    %116 = arith.truncf %cst_57 : f32 to bf16
    %117 = vector.broadcast %116 : bf16 to vector<16x1xbf16>
    %118 = arith.select %115, %107, %117 : vector<16x1xi1>, vector<16x1xbf16>
    %119 = arith.maximumf %100, %118 : vector<16x1xbf16>
    %cst_58 = arith.constant -3.000000e+38 : f32
    %120 = arith.truncf %cst_58 : f32 to bf16
    %121 = vector.broadcast %120 : bf16 to vector<16x512xbf16>
    %122 = arith.select %109, %121, %105 : vector<16x512xi1>, vector<16x512xbf16>
    %c0_59 = arith.constant 0 : index
    %c0_60 = arith.constant 0 : index
    %123 = vector.load %arg6[%c0_59, %c0_60] : memref<16x512xbf16, #tpu.memory_space<vmem>>, vector<16x512xbf16>
    tpu.vector_store %arg6[%c0_59, %c0_60], %122 {strides = array<i32>} : memref<16x512xbf16, #tpu.memory_space<vmem>>, vector<16x512xbf16>,
    %c0_61 = arith.constant 0 : index
    %c0_62 = arith.constant 0 : index
    %124 = vector.load %arg6[%c0_61, %c0_62] : memref<16x512xbf16, #tpu.memory_space<vmem>>, vector<16x512xbf16>
    %cst_63 = arith.constant dense<0xFF80> : vector<16xbf16>
    %125 = vector.multi_reduction <maximumf>, %124, %cst_63 [1] : vector<16x512xbf16> to vector<16xbf16>
    %126 = vector.shape_cast %125 : vector<16xbf16> to vector<16x1xbf16>
    %127 = vector.broadcast %126 : vector<16x1xbf16> to vector<16x512xbf16>
    %128 = arith.cmpf oeq, %124, %127 : vector<16x512xbf16>
    %129 = arith.extui %128 : vector<16x512xi1> to vector<16x512xi32>
    %cst_64 = arith.constant dense<0> : vector<16xi32>
    %130 = vector.multi_reduction <add>, %129, %cst_64 [1] : vector<16x512xi32> to vector<16xi32>
    %131 = vector.shape_cast %130 : vector<16xi32> to vector<16x1xi32>
    %132 = arith.addi %113, %131 : vector<16x1xi32>
    %c10_i32_65 = arith.constant 10 : i32
    %133 = vector.broadcast %c10_i32_65 : i32 to vector<16x1xi32>
    %134 = arith.cmpi sge, %132, %133 : vector<16x1xi32>
    %cst_66 = arith.constant -3.000000e+38 : f32
    %135 = arith.truncf %cst_66 : f32 to bf16
    %136 = vector.broadcast %135 : bf16 to vector<16x1xbf16>
    %137 = arith.select %134, %126, %136 : vector<16x1xi1>, vector<16x1xbf16>
    %138 = arith.maximumf %119, %137 : vector<16x1xbf16>
    %cst_67 = arith.constant -3.000000e+38 : f32
    %139 = arith.truncf %cst_67 : f32 to bf16
    %140 = vector.broadcast %139 : bf16 to vector<16x512xbf16>
    %141 = arith.select %128, %140, %124 : vector<16x512xi1>, vector<16x512xbf16>
    %c0_68 = arith.constant 0 : index
    %c0_69 = arith.constant 0 : index
    %142 = vector.load %arg6[%c0_68, %c0_69] : memref<16x512xbf16, #tpu.memory_space<vmem>>, vector<16x512xbf16>
    tpu.vector_store %arg6[%c0_68, %c0_69], %141 {strides = array<i32>} : memref<16x512xbf16, #tpu.memory_space<vmem>>, vector<16x512xbf16>,
    %c0_70 = arith.constant 0 : index
    %c0_71 = arith.constant 0 : index
    %143 = vector.load %arg6[%c0_70, %c0_71] : memref<16x512xbf16, #tpu.memory_space<vmem>>, vector<16x512xbf16>
    %cst_72 = arith.constant dense<0xFF80> : vector<16xbf16>
    %144 = vector.multi_reduction <maximumf>, %143, %cst_72 [1] : vector<16x512xbf16> to vector<16xbf16>
    %145 = vector.shape_cast %144 : vector<16xbf16> to vector<16x1xbf16>
    %146 = vector.broadcast %145 : vector<16x1xbf16> to vector<16x512xbf16>
    %147 = arith.cmpf oeq, %143, %146 : vector<16x512xbf16>
    %148 = arith.extui %147 : vector<16x512xi1> to vector<16x512xi32>
    %cst_73 = arith.constant dense<0> : vector<16xi32>
    %149 = vector.multi_reduction <add>, %148, %cst_73 [1] : vector<16x512xi32> to vector<16xi32>
    %150 = vector.shape_cast %149 : vector<16xi32> to vector<16x1xi32>
    %151 = arith.addi %132, %150 : vector<16x1xi32>
    %c10_i32_74 = arith.constant 10 : i32
    %152 = vector.broadcast %c10_i32_74 : i32 to vector<16x1xi32>
    %153 = arith.cmpi sge, %151, %152 : vector<16x1xi32>
    %cst_75 = arith.constant -3.000000e+38 : f32
    %154 = arith.truncf %cst_75 : f32 to bf16
    %155 = vector.broadcast %154 : bf16 to vector<16x1xbf16>
    %156 = arith.select %153, %145, %155 : vector<16x1xi1>, vector<16x1xbf16>
    %157 = arith.maximumf %138, %156 : vector<16x1xbf16>
    %cst_76 = arith.constant -3.000000e+38 : f32
    %158 = arith.truncf %cst_76 : f32 to bf16
    %159 = vector.broadcast %158 : bf16 to vector<16x512xbf16>
    %160 = arith.select %147, %159, %143 : vector<16x512xi1>, vector<16x512xbf16>
    %c0_77 = arith.constant 0 : index
    %c0_78 = arith.constant 0 : index
    %161 = vector.load %arg6[%c0_77, %c0_78] : memref<16x512xbf16, #tpu.memory_space<vmem>>, vector<16x512xbf16>
    tpu.vector_store %arg6[%c0_77, %c0_78], %160 {strides = array<i32>} : memref<16x512xbf16, #tpu.memory_space<vmem>>, vector<16x512xbf16>,
    %c0_79 = arith.constant 0 : index
    %c0_80 = arith.constant 0 : index
    %162 = vector.load %arg6[%c0_79, %c0_80] : memref<16x512xbf16, #tpu.memory_space<vmem>>, vector<16x512xbf16>
    %cst_81 = arith.constant dense<0xFF80> : vector<16xbf16>
    %163 = vector.multi_reduction <maximumf>, %162, %cst_81 [1] : vector<16x512xbf16> to vector<16xbf16>
    %164 = vector.shape_cast %163 : vector<16xbf16> to vector<16x1xbf16>
    %165 = vector.broadcast %164 : vector<16x1xbf16> to vector<16x512xbf16>
    %166 = arith.cmpf oeq, %162, %165 : vector<16x512xbf16>
    %167 = arith.extui %166 : vector<16x512xi1> to vector<16x512xi32>
    %cst_82 = arith.constant dense<0> : vector<16xi32>
    %168 = vector.multi_reduction <add>, %167, %cst_82 [1] : vector<16x512xi32> to vector<16xi32>
    %169 = vector.shape_cast %168 : vector<16xi32> to vector<16x1xi32>
    %170 = arith.addi %151, %169 : vector<16x1xi32>
    %c10_i32_83 = arith.constant 10 : i32
    %171 = vector.broadcast %c10_i32_83 : i32 to vector<16x1xi32>
    %172 = arith.cmpi sge, %170, %171 : vector<16x1xi32>
    %cst_84 = arith.constant -3.000000e+38 : f32
    %173 = arith.truncf %cst_84 : f32 to bf16
    %174 = vector.broadcast %173 : bf16 to vector<16x1xbf16>
    %175 = arith.select %172, %164, %174 : vector<16x1xi1>, vector<16x1xbf16>
    %176 = arith.maximumf %157, %175 : vector<16x1xbf16>
    %cst_85 = arith.constant -3.000000e+38 : f32
    %177 = arith.truncf %cst_85 : f32 to bf16
    %178 = vector.broadcast %177 : bf16 to vector<16x512xbf16>
    %179 = arith.select %166, %178, %162 : vector<16x512xi1>, vector<16x512xbf16>
    %c0_86 = arith.constant 0 : index
    %c0_87 = arith.constant 0 : index
    %180 = vector.load %arg6[%c0_86, %c0_87] : memref<16x512xbf16, #tpu.memory_space<vmem>>, vector<16x512xbf16>
    tpu.vector_store %arg6[%c0_86, %c0_87], %179 {strides = array<i32>} : memref<16x512xbf16, #tpu.memory_space<vmem>>, vector<16x512xbf16>,
    %c0_88 = arith.constant 0 : index
    %c0_89 = arith.constant 0 : index
    %181 = vector.load %arg6[%c0_88, %c0_89] : memref<16x512xbf16, #tpu.memory_space<vmem>>, vector<16x512xbf16>
    %cst_90 = arith.constant dense<0xFF80> : vector<16xbf16>
    %182 = vector.multi_reduction <maximumf>, %181, %cst_90 [1] : vector<16x512xbf16> to vector<16xbf16>
    %183 = vector.shape_cast %182 : vector<16xbf16> to vector<16x1xbf16>
    %184 = vector.broadcast %183 : vector<16x1xbf16> to vector<16x512xbf16>
    %185 = arith.cmpf oeq, %181, %184 : vector<16x512xbf16>
    %186 = arith.extui %185 : vector<16x512xi1> to vector<16x512xi32>
    %cst_91 = arith.constant dense<0> : vector<16xi32>
    %187 = vector.multi_reduction <add>, %186, %cst_91 [1] : vector<16x512xi32> to vector<16xi32>
    %188 = vector.shape_cast %187 : vector<16xi32> to vector<16x1xi32>
    %189 = arith.addi %170, %188 : vector<16x1xi32>
    %c10_i32_92 = arith.constant 10 : i32
    %190 = vector.broadcast %c10_i32_92 : i32 to vector<16x1xi32>
    %191 = arith.cmpi sge, %189, %190 : vector<16x1xi32>
    %cst_93 = arith.constant -3.000000e+38 : f32
    %192 = arith.truncf %cst_93 : f32 to bf16
    %193 = vector.broadcast %192 : bf16 to vector<16x1xbf16>
    %194 = arith.select %191, %183, %193 : vector<16x1xi1>, vector<16x1xbf16>
    %195 = arith.maximumf %176, %194 : vector<16x1xbf16>
    %c0_94 = arith.constant 0 : index
    %c0_95 = arith.constant 0 : index
    %196 = vector.load %arg5[%c0_94, %c0_95] : memref<16x512xbf16, #tpu.memory_space<vmem>>, vector<16x512xbf16>
    %197 = vector.broadcast %195 : vector<16x1xbf16> to vector<16x512xbf16>
    %198 = arith.cmpf oge, %196, %197 : vector<16x512xbf16>
    %199 = arith.extui %198 : vector<16x512xi1> to vector<16x512xi32>
    %200 = arith.sitofp %199 : vector<16x512xi32> to vector<16x512xf32>
    %c0_96 = arith.constant 0 : index
    %c0_97 = arith.constant 0 : index
    %201 = vector.load %arg4[%c0_96, %c0_97] : memref<16x512xf32, #tpu.memory_space<vmem>>, vector<16x512xf32>
    tpu.vector_store %arg4[%c0_96, %c0_97], %200 {strides = array<i32>} : memref<16x512xf32, #tpu.memory_space<vmem>>, vector<16x512xf32>,
    return
  }
  func.func @transform_0(%arg0: i32) -> (i32, i32) {
    %c0_i32 = arith.constant 0 : i32
    %c0_i32_0 = arith.constant 0 : i32
    return %arg0, %c0_i32 : i32, i32
  }
  func.func @transform_1(%arg0: i32) -> (i32, i32) {
    %c0_i32 = arith.constant 0 : i32
    %c0_i32_0 = arith.constant 0 : i32
    %c0_i32_1 = arith.constant 0 : i32
    return %c0_i32, %c0_i32_0 : i32, i32
  }
  func.func @transform_2(%arg0: i32) -> (i32, i32) {
    %c0_i32 = arith.constant 0 : i32
    %c0_i32_0 = arith.constant 0 : i32
    %c0_i32_1 = arith.constant 0 : i32
    return %c0_i32, %c0_i32_0 : i32, i32
  }
  func.func @transform_3(%arg0: i32) -> (i32, i32) {
    %c0_i32 = arith.constant 0 : i32
    %c0_i32_0 = arith.constant 0 : i32
    return %arg0, %c0_i32 : i32, i32
  }
}

</mosaic_0001>

<bundles_post_ra>
// kernel: tpu_custom_call.1
= control target key start
LH: loop header
LB: loop body
LE: loop exit
PB: predicated region body
PF: predicated region fallthrough
CT: control target
= control target key end

     0   :  { %8 = vsyncpa [#allocation5], 0  ;;  %s3251_s0 = inlined_call_operand.hbm [shape: bf16[16,512], index: 0, kind: input, shape index: {}]   ;;  %s3252_s1 = inlined_call_operand.hbm [shape: bf16[512,512], index: 1, kind: input, shape index: {}]   ;;  %s3253_s2 = inlined_call_operand.vmem [shape: f32[1,512], index: 2, kind: input, shape index: {}]   ;;  %s3254_s3 = inlined_call_operand.hbm [shape: f32[16,512], index: 3, kind: output, shape index: {}]  }
   0x1   :  { %9 = vsyncpa [#allocation8], 0 }
   0x2   :  { %10 = vsyncpa [#allocation6], 0  ;;  %s2674_s12 = smov [#allocation4]   ;;  %s2602_s16 = scalar_lea.hbm %s3251_s0, 512 }
   0x3   :  { %s16_s13 = sshll.u32 %s2674_s12, 4  ;;  %p2603_p0 = scmp.ne.s32.totalorder %s3251_s0, %s2602_s16  ;;  %s17_s13 = int_to_ptr.vmem [resolvable:$true] %s16_s13 }
   0x4   :  { %p2606_p1 = scmp.lt.u32.totalorder %s2602_s16, %s3251_s0 }
   0x6   :  { %p2608_p2 = pnand %p2606_p1, %p2603_p0 }
   0x8   :  { %2611 = shalt.err (!%p2608_p2)
}
   0x9   :  { %s2612_s21 = scalar_lea.vmem %s17_s13, 512  ;;  %p2617_p4 = scmp.lt.s32.totalorder %s17_s13, %s17_s13 }
   0xa   :  { %p2613_p3 = scmp.ne.s32.totalorder %s17_s13, %s2612_s21  ;;  %p2618_p5 = scmp.lt.s32.totalorder %s2612_s21, %s2612_s21 }
   0xc   :  { %p2619_p6 = por %p2618_p5, %p2617_p4 }
   0xe   :  { %p2620_p7 = pnand %p2619_p6, %p2613_p3 }
  0x10   :  { %2623 = shalt.err (!%p2620_p7)
}
  0x11   :  { %s2675_s22 = smov 256   ;;  %s2676_s23 = smov 16  }
  0x12   :  { %22 = dma.hbm_to_vmem [thread:$0]  %s3251_s0, 512, %s17_s13, [#allocation5], %s2675_s22, %s2675_s22, %s2676_s23  }
  0x13   :  { %s2677_s26 = smov [#allocation7]   ;;  %s2624_s30 = scalar_lea.hbm %s3252_s1, 16384 }
  0x14   :  { %s28_s27 = sshll.u32 %s2677_s26, 4  ;;  %p2625_p8 = scmp.ne.s32.totalorder %s3252_s1, %s2624_s30  ;;  %s29_s27 = int_to_ptr.vmem [resolvable:$true] %s28_s27 }
  0x15   :  { %p2628_p9 = scmp.lt.u32.totalorder %s2624_s30, %s3252_s1 }
  0x17   :  { %p2630_p10 = pnand %p2628_p9, %p2625_p8 }
  0x19   :  { %2633 = shalt.err (!%p2630_p10)
}
  0x1a   :  { %s2634_s8 = scalar_lea.vmem %s29_s27, 16384  ;;  %p2639_p12 = scmp.lt.s32.totalorder %s29_s27, %s29_s27 }
  0x1b   :  { %p2635_p11 = scmp.ne.s32.totalorder %s29_s27, %s2634_s8  ;;  %p2640_p13 = scmp.lt.s32.totalorder %s2634_s8, %s2634_s8 }
  0x1d   :  { %p2641_p0 = por %p2640_p13, %p2639_p12 }
  0x1f   :  { %p2642_p1 = pnand %p2641_p0, %p2635_p11 }
  0x21   :  { %2645 = shalt.err (!%p2642_p1)
}
  0x22   :  { %34 = dma.hbm_to_vmem [thread:$0]  %s3252_s1, 16384, %s29_s27, [#allocation8], %s2675_s22, %s2675_s22, %s2676_s23  }
  0x23   :  { %2668 = dma.done.wait [#allocation5], 512  }
  0x24   :  { %2669 = vsyncadd [#allocation5], 4294966784 }
  0x25   :  { %2670 = dma.done.wait [#allocation8], 16384  }
  0x26   :  { %2671 = vsyncadd [#allocation8], 4294950912  ;;  %v2404_v0 = vld [vmem:[#allocation7 + $0x4] ss:$16 sps:$4 sm:$0xff]   ;;  %v2406_v1 = vld [vmem:[#allocation7 + $0xc] ss:$16 sps:$4 sm:$0xff]  }
  0x27   :  { %860 = vmatprep.subr.bf16.mxu0 %v2404_v0  ;;  %v2408_v2 = vld [vmem:[#allocation7] ss:$16 sps:$4 sm:$0xff]   ;;  %v2409_v3 = vld [vmem:[#allocation7 + $0x8] ss:$16 sps:$4 sm:$0xff]   ;;  %946 = vmatprep.subr.bf16.mxu1 %v2406_v1  ;;  %v2410_v4 = vld [vmem:[#allocation7 + $0x24] ss:$16 sps:$4 sm:$0xff]  }
  0x28   :  { %861 = vmatpush1.bf16.msra.mxu0 %v2408_v2  ;;  %947 = vmatpush1.bf16.msra.mxu1 %v2409_v3  ;;  %v2412_v5 = vld [vmem:[#allocation7 + $0x2c] ss:$16 sps:$4 sm:$0xff]   ;;  %v2414_v6 = vld [vmem:[#allocation7 + $0x20] ss:$16 sps:$4 sm:$0xff]   ;;  %v2415_v7 = vld [vmem:[#allocation7 + $0x28] ss:$16 sps:$4 sm:$0xff]  }
  0x29   :  { %862 = vmatprep.subr.bf16.mxu0 %v2410_v4  ;;  %948 = vmatprep.subr.bf16.mxu1 %v2412_v5  ;;  %v2416_v8 = vld [vmem:[#allocation7 + $0x44] ss:$16 sps:$4 sm:$0xff]   ;;  %v2418_v9 = vld [vmem:[#allocation7 + $0x4c] ss:$16 sps:$4 sm:$0xff]   ;;  %v2420_v10 = vld [vmem:[#allocation7 + $0x40] ss:$16 sps:$4 sm:$0xff]  }
  0x2a   :  { %v2421_v11 = vld [vmem:[#allocation7 + $0x48] ss:$16 sps:$4 sm:$0xff]   ;;  %v2422_v12 = vld [vmem:[#allocation7 + $0x64] ss:$16 sps:$4 sm:$0xff]   ;;  %v2424_v13 = vld [vmem:[#allocation7 + $0x6c] ss:$16 sps:$4 sm:$0xff]  }
  0x2b   :  { %v2426_v14 = vld [vmem:[#allocation7 + $0x60] ss:$16 sps:$4 sm:$0xff]   ;;  %v2427_v15 = vld [vmem:[#allocation7 + $0x68] ss:$16 sps:$4 sm:$0xff]   ;;  %v2428_v16 = vld [vmem:[#allocation7 + $0x84] ss:$16 sps:$4 sm:$0xff]  }
  0x2c   :  { %863 = vmatpush1.bf16.msra.mxu0 %v2414_v6  ;;  %949 = vmatpush1.bf16.msra.mxu1 %v2415_v7  ;;  %v2430_v17 = vld [vmem:[#allocation7 + $0x8c] ss:$16 sps:$4 sm:$0xff]   ;;  %v2432_v18 = vld [vmem:[#allocation7 + $0x80] ss:$16 sps:$4 sm:$0xff]   ;;  %v2433_v19 = vld [vmem:[#allocation7 + $0x88] ss:$16 sps:$4 sm:$0xff]  }
  0x2d   :  { %864 = vmatprep.subr.bf16.mxu0 %v2416_v8  ;;  %950 = vmatprep.subr.bf16.mxu1 %v2418_v9  ;;  %v2434_v20 = vld [vmem:[#allocation7 + $0xa4] ss:$16 sps:$4 sm:$0xff]   ;;  %v2436_v21 = vld [vmem:[#allocation7 + $0xac] ss:$16 sps:$4 sm:$0xff]   ;;  %v2438_v22 = vld [vmem:[#allocation7 + $0xa0] ss:$16 sps:$4 sm:$0xff]  }
  0x2e   :  { %v2439_v23 = vld [vmem:[#allocation7 + $0xa8] ss:$16 sps:$4 sm:$0xff]   ;;  %v2440_v24 = vld [vmem:[#allocation7 + $0xc4] ss:$16 sps:$4 sm:$0xff]   ;;  %v2442_v25 = vld [vmem:[#allocation7 + $0xcc] ss:$16 sps:$4 sm:$0xff]  }
  0x2f   :  { %v2444_v26 = vld [vmem:[#allocation7 + $0xc0] ss:$16 sps:$4 sm:$0xff]   ;;  %v2445_v27 = vld [vmem:[#allocation7 + $0xc8] ss:$16 sps:$4 sm:$0xff]   ;;  %v2446_v28 = vld [vmem:[#allocation7 + $0xe4] ss:$16 sps:$4 sm:$0xff]  }
  0x30   :  { %865 = vmatpush1.bf16.msra.mxu0 %v2420_v10  ;;  %951 = vmatpush1.bf16.msra.mxu1 %v2421_v11  ;;  %v2448_v29 = vld [vmem:[#allocation7 + $0xec] ss:$16 sps:$4 sm:$0xff]   ;;  %v2450_v30 = vld [vmem:[#allocation7 + $0xe0] ss:$16 sps:$4 sm:$0xff]   ;;  %v2451_v31 = vld [vmem:[#allocation7 + $0xe8] ss:$16 sps:$4 sm:$0xff]  }
  0x31   :  { %866 = vmatprep.subr.bf16.mxu0 %v2422_v12  ;;  %952 = vmatprep.subr.bf16.mxu1 %v2424_v13  ;;  %v2452_v32 = vld [vmem:[#allocation7 + $0x104] ss:$16 sps:$4 sm:$0xff]   ;;  %v2454_v33 = vld [vmem:[#allocation7 + $0x10c] ss:$16 sps:$4 sm:$0xff]   ;;  %v2456_v34 = vld [vmem:[#allocation7 + $0x100] ss:$16 sps:$4 sm:$0xff]  }
  0x32   :  { %v2457_v35 = vld [vmem:[#allocation7 + $0x108] ss:$16 sps:$4 sm:$0xff]   ;;  %v2458_v36 = vld [vmem:[#allocation7 + $0x124] ss:$16 sps:$4 sm:$0xff]   ;;  %v2460_v37 = vld [vmem:[#allocation7 + $0x12c] ss:$16 sps:$4 sm:$0xff]  }
  0x33   :  { %v2462_v38 = vld [vmem:[#allocation7 + $0x120] ss:$16 sps:$4 sm:$0xff]   ;;  %v2463_v39 = vld [vmem:[#allocation7 + $0x128] ss:$16 sps:$4 sm:$0xff]   ;;  %v2464_v40 = vld [vmem:[#allocation7 + $0x144] ss:$16 sps:$4 sm:$0xff]  }
  0x34   :  { %867 = vmatpush1.bf16.msra.mxu0 %v2426_v14  ;;  %953 = vmatpush1.bf16.msra.mxu1 %v2427_v15  ;;  %v2466_v41 = vld [vmem:[#allocation7 + $0x14c] ss:$16 sps:$4 sm:$0xff]   ;;  %v2468_v42 = vld [vmem:[#allocation7 + $0x140] ss:$16 sps:$4 sm:$0xff]   ;;  %v2469_v43 = vld [vmem:[#allocation7 + $0x148] ss:$16 sps:$4 sm:$0xff]  }
  0x35   :  { %868 = vmatprep.subr.bf16.mxu0 %v2428_v16  ;;  %954 = vmatprep.subr.bf16.mxu1 %v2430_v17  ;;  %v2470_v44 = vld [vmem:[#allocation7 + $0x164] ss:$16 sps:$4 sm:$0xff]   ;;  %v2472_v45 = vld [vmem:[#allocation7 + $0x16c] ss:$16 sps:$4 sm:$0xff]   ;;  %v2474_v46 = vld [vmem:[#allocation7 + $0x160] ss:$16 sps:$4 sm:$0xff]  }
  0x36   :  { %v2475_v47 = vld [vmem:[#allocation7 + $0x168] ss:$16 sps:$4 sm:$0xff]   ;;  %v2502_v48 = vld [vmem:[#allocation4 + $0x4] ss:$16 sps:$4 sm:$0xff]   ;;  %v2478_v50 = vld [vmem:[#allocation7 + $0x18c] ss:$16 sps:$4 sm:$0xff]  }
  0x37   :  { %v2476_v49 = vld [vmem:[#allocation7 + $0x184] ss:$16 sps:$4 sm:$0xff]   ;;  %892 = vmatprep.mubr.bf16.mxu0 %v2502_v48  ;;  %978 = vmatprep.mubr.bf16.mxu1 %v2502_v48  ;;  %v2480_v51 = vld [vmem:[#allocation7 + $0x180] ss:$16 sps:$4 sm:$0xff]   ;;  %v2481_v52 = vld [vmem:[#allocation7 + $0x188] ss:$16 sps:$4 sm:$0xff]  }
  0x38   :  { %869 = vmatpush1.bf16.msra.mxu0 %v2432_v18  ;;  %955 = vmatpush1.bf16.msra.mxu1 %v2433_v19  ;;  %v2482_v53 = vld [vmem:[#allocation7 + $0x1a4] ss:$16 sps:$4 sm:$0xff]   ;;  %v2484_v54 = vld [vmem:[#allocation7 + $0x1ac] ss:$16 sps:$4 sm:$0xff]   ;;  %v2486_v55 = vld [vmem:[#allocation7 + $0x1a0] ss:$16 sps:$4 sm:$0xff]  }
  0x39   :  { %870 = vmatprep.subr.bf16.mxu0 %v2434_v20  ;;  %956 = vmatprep.subr.bf16.mxu1 %v2436_v21  ;;  %v2487_v56 = vld [vmem:[#allocation7 + $0x1a8] ss:$16 sps:$4 sm:$0xff]   ;;  %v2488_v57 = vld [vmem:[#allocation7 + $0x1c4] ss:$16 sps:$4 sm:$0xff]   ;;  %v2490_v58 = vld [vmem:[#allocation7 + $0x1cc] ss:$16 sps:$4 sm:$0xff]  }
  0x3a   :  { %v2492_v59 = vld [vmem:[#allocation7 + $0x1c0] ss:$16 sps:$4 sm:$0xff]   ;;  %v2493_v60 = vld [vmem:[#allocation7 + $0x1c8] ss:$16 sps:$4 sm:$0xff]   ;;  %v2494_v61 = vld [vmem:[#allocation7 + $0x1e4] ss:$16 sps:$4 sm:$0xff]  }
  0x3b   :  { %v2496_v62 = vld [vmem:[#allocation7 + $0x1ec] ss:$16 sps:$4 sm:$0xff]   ;;  %v2498_v63 = vld [vmem:[#allocation7 + $0x1e0] ss:$16 sps:$4 sm:$0xff]   ;;  %v2499_v0 = vld [vmem:[#allocation7 + $0x1e8] ss:$16 sps:$4 sm:$0xff]  }
  0x3c   :  { %871 = vmatpush1.bf16.msra.mxu0 %v2438_v22  ;;  %957 = vmatpush1.bf16.msra.mxu1 %v2439_v23  ;;  %v2505_v1 = vld [vmem:[#allocation7 + $0x204] ss:$16 sps:$4 sm:$0xff]   ;;  %v2508_v2 = vld [vmem:[#allocation7 + $0x20c] ss:$16 sps:$4 sm:$0xff]   ;;  %v2500_v3 = vld [vmem:[#allocation4] ss:$16 sps:$4 sm:$0xff]  }
  0x3d   :  { %872 = vmatprep.subr.bf16.mxu0 %v2440_v24  ;;  %958 = vmatprep.subr.bf16.mxu1 %v2442_v25  ;;  %v2503_v4 = vld [vmem:[#allocation7 + $0x200] ss:$16 sps:$4 sm:$0xff]   ;;  %v2506_v5 = vld [vmem:[#allocation7 + $0x208] ss:$16 sps:$4 sm:$0xff]   ;;  %v2511_v6 = vld [vmem:[#allocation7 + $0x224] ss:$16 sps:$4 sm:$0xff]  }
  0x3e   :  { %v2514_v7 = vld [vmem:[#allocation7 + $0x22c] ss:$16 sps:$4 sm:$0xff]   ;;  %v2509_v8 = vld [vmem:[#allocation7 + $0x220] ss:$16 sps:$4 sm:$0xff]   ;;  %v2512_v9 = vld [vmem:[#allocation7 + $0x228] ss:$16 sps:$4 sm:$0xff]  }
  0x3f   :  { %v2517_v10 = vld [vmem:[#allocation7 + $0x244] ss:$16 sps:$4 sm:$0xff]   ;;  %v2520_v11 = vld [vmem:[#allocation7 + $0x24c] ss:$16 sps:$4 sm:$0xff]   ;;  %v2515_v12 = vld [vmem:[#allocation7 + $0x240] ss:$16 sps:$4 sm:$0xff]  }
  0x40   :  { %873 = vmatpush1.bf16.msra.mxu0 %v2444_v26  ;;  %959 = vmatpush1.bf16.msra.mxu1 %v2445_v27  ;;  %v2518_v13 = vld [vmem:[#allocation7 + $0x248] ss:$16 sps:$4 sm:$0xff]   ;;  %v2523_v14 = vld [vmem:[#allocation7 + $0x264] ss:$16 sps:$4 sm:$0xff]   ;;  %v2526_v15 = vld [vmem:[#allocation7 + $0x26c] ss:$16 sps:$4 sm:$0xff]  }
  0x41   :  { %874 = vmatprep.subr.bf16.mxu0 %v2446_v28  ;;  %960 = vmatprep.subr.bf16.mxu1 %v2448_v29  ;;  %v2521_v16 = vld [vmem:[#allocation7 + $0x260] ss:$16 sps:$4 sm:$0xff]   ;;  %v2524_v17 = vld [vmem:[#allocation7 + $0x268] ss:$16 sps:$4 sm:$0xff]   ;;  %v2529_v18 = vld [vmem:[#allocation7 + $0x284] ss:$16 sps:$4 sm:$0xff]  }
  0x42   :  { %v2532_v19 = vld [vmem:[#allocation7 + $0x28c] ss:$16 sps:$4 sm:$0xff]   ;;  %v2527_v20 = vld [vmem:[#allocation7 + $0x280] ss:$16 sps:$4 sm:$0xff]   ;;  %v2530_v21 = vld [vmem:[#allocation7 + $0x288] ss:$16 sps:$4 sm:$0xff]  }
  0x43   :  { %v2535_v22 = vld [vmem:[#allocation7 + $0x2a4] ss:$16 sps:$4 sm:$0xff]   ;;  %v2538_v23 = vld [vmem:[#allocation7 + $0x2ac] ss:$16 sps:$4 sm:$0xff]   ;;  %v2533_v24 = vld [vmem:[#allocation7 + $0x2a0] ss:$16 sps:$4 sm:$0xff]  }
  0x44   :  { %875 = vmatpush1.bf16.msra.mxu0 %v2450_v30  ;;  %961 = vmatpush1.bf16.msra.mxu1 %v2451_v31  ;;  %v2536_v25 = vld [vmem:[#allocation7 + $0x2a8] ss:$16 sps:$4 sm:$0xff]   ;;  %v2541_v26 = vld [vmem:[#allocation7 + $0x2c4] ss:$16 sps:$4 sm:$0xff]   ;;  %v2544_v27 = vld [vmem:[#allocation7 + $0x2cc] ss:$16 sps:$4 sm:$0xff]  }
  0x45   :  { %876 = vmatprep.subr.bf16.mxu0 %v2452_v32  ;;  %962 = vmatprep.subr.bf16.mxu1 %v2454_v33  ;;  %v2601_v28 = vld [vmem:[#allocation4 + $0xc] ss:$16 sps:$4 sm:$0xff]   ;;  %v2539_v29 = vld [vmem:[#allocation7 + $0x2c0] ss:$16 sps:$4 sm:$0xff]   ;;  %v2542_v30 = vld [vmem:[#allocation7 + $0x2c8] ss:$16 sps:$4 sm:$0xff]  }
  0x46   :  { %v2547_v31 = vld [vmem:[#allocation7 + $0x2e4] ss:$16 sps:$4 sm:$0xff]   ;;  %v2550_v32 = vld [vmem:[#allocation7 + $0x2ec] ss:$16 sps:$4 sm:$0xff]   ;;  %v2545_v33 = vld [vmem:[#allocation7 + $0x2e0] ss:$16 sps:$4 sm:$0xff]  }
  0x47   :  { %v2574_v48 = vld [vmem:[#allocation7 + $0x36c] ss:$16 sps:$4 sm:$0xff]  }
  0x48   :  { %877 = vmatpush1.bf16.msra.mxu0 %v2456_v34  ;;  %963 = vmatpush1.bf16.msra.mxu1 %v2457_v35  ;;  %v2548_v34 = vld [vmem:[#allocation7 + $0x2e8] ss:$16 sps:$4 sm:$0xff]   ;;  %v2553_v35 = vld [vmem:[#allocation7 + $0x304] ss:$16 sps:$4 sm:$0xff]  }
  0x49   :  { %878 = vmatprep.subr.bf16.mxu0 %v2458_v36  ;;  %964 = vmatprep.subr.bf16.mxu1 %v2460_v37  ;;  %v2556_v36 = vld [vmem:[#allocation7 + $0x30c] ss:$16 sps:$4 sm:$0xff]   ;;  %v2551_v37 = vld [vmem:[#allocation7 + $0x300] ss:$16 sps:$4 sm:$0xff]  }
  0x4c   :  { %879 = vmatpush1.bf16.msra.mxu0 %v2462_v38  ;;  %965 = vmatpush1.bf16.msra.mxu1 %v2463_v39  ;;  %v2554_v38 = vld [vmem:[#allocation7 + $0x308] ss:$16 sps:$4 sm:$0xff]   ;;  %v2559_v39 = vld [vmem:[#allocation7 + $0x324] ss:$16 sps:$4 sm:$0xff]  }
  0x4d   :  { %880 = vmatprep.subr.bf16.mxu0 %v2464_v40  ;;  %966 = vmatprep.subr.bf16.mxu1 %v2466_v41  ;;  %v2562_v40 = vld [vmem:[#allocation7 + $0x32c] ss:$16 sps:$4 sm:$0xff]   ;;  %v2557_v41 = vld [vmem:[#allocation7 + $0x320] ss:$16 sps:$4 sm:$0xff]  }
  0x50   :  { %881 = vmatpush1.bf16.msra.mxu0 %v2468_v42  ;;  %967 = vmatpush1.bf16.msra.mxu1 %v2469_v43  ;;  %v2560_v42 = vld [vmem:[#allocation7 + $0x328] ss:$16 sps:$4 sm:$0xff]   ;;  %v2565_v43 = vld [vmem:[#allocation7 + $0x344] ss:$16 sps:$4 sm:$0xff]  }
  0x51   :  { %882 = vmatprep.subr.bf16.mxu0 %v2470_v44  ;;  %968 = vmatprep.subr.bf16.mxu1 %v2472_v45  ;;  %v2568_v44 = vld [vmem:[#allocation7 + $0x34c] ss:$16 sps:$4 sm:$0xff]   ;;  %v2563_v45 = vld [vmem:[#allocation7 + $0x340] ss:$16 sps:$4 sm:$0xff]  }
  0x54   :  { %883 = vmatpush1.bf16.msra.mxu0 %v2474_v46  ;;  %969 = vmatpush1.bf16.msra.mxu1 %v2475_v47  ;;  %v2566_v46 = vld [vmem:[#allocation7 + $0x348] ss:$16 sps:$4 sm:$0xff]   ;;  %v2571_v47 = vld [vmem:[#allocation7 + $0x364] ss:$16 sps:$4 sm:$0xff]  }
  0x55   :  { %884 = vmatprep.subr.bf16.mxu0 %v2476_v49  ;;  %970 = vmatprep.subr.bf16.mxu1 %v2478_v50  ;;  %v2569_v49 = vld [vmem:[#allocation7 + $0x360] ss:$16 sps:$4 sm:$0xff]   ;;  %v2572_v50 = vld [vmem:[#allocation7 + $0x368] ss:$16 sps:$4 sm:$0xff]  }
  0x58   :  { %885 = vmatpush1.bf16.msra.mxu0 %v2480_v51  ;;  %971 = vmatpush1.bf16.msra.mxu1 %v2481_v52  ;;  %v2577_v51 = vld [vmem:[#allocation7 + $0x384] ss:$16 sps:$4 sm:$0xff]   ;;  %v2580_v52 = vld [vmem:[#allocation7 + $0x38c] ss:$16 sps:$4 sm:$0xff]  }
  0x59   :  { %886 = vmatprep.subr.bf16.mxu0 %v2482_v53  ;;  %972 = vmatprep.subr.bf16.mxu1 %v2484_v54  ;;  %v2575_v53 = vld [vmem:[#allocation7 + $0x380] ss:$16 sps:$4 sm:$0xff]   ;;  %v2578_v54 = vld [vmem:[#allocation7 + $0x388] ss:$16 sps:$4 sm:$0xff]  }
  0x5c   :  { %887 = vmatpush1.bf16.msra.mxu0 %v2486_v55  ;;  %973 = vmatpush1.bf16.msra.mxu1 %v2487_v56  ;;  %v2583_v55 = vld [vmem:[#allocation7 + $0x3a4] ss:$16 sps:$4 sm:$0xff]   ;;  %v2586_v56 = vld [vmem:[#allocation7 + $0x3ac] ss:$16 sps:$4 sm:$0xff]  }
  0x5d   :  { %888 = vmatprep.subr.bf16.mxu0 %v2488_v57  ;;  %974 = vmatprep.subr.bf16.mxu1 %v2490_v58  ;;  %v2581_v57 = vld [vmem:[#allocation7 + $0x3a0] ss:$16 sps:$4 sm:$0xff]   ;;  %v2584_v58 = vld [vmem:[#allocation7 + $0x3a8] ss:$16 sps:$4 sm:$0xff]  }
  0x60   :  { %889 = vmatpush1.bf16.msra.mxu0 %v2492_v59  ;;  %975 = vmatpush1.bf16.msra.mxu1 %v2493_v60  ;;  %v2589_v59 = vld [vmem:[#allocation7 + $0x3c4] ss:$16 sps:$4 sm:$0xff]   ;;  %v2592_v60 = vld [vmem:[#allocation7 + $0x3cc] ss:$16 sps:$4 sm:$0xff]  }
  0x61   :  { %890 = vmatprep.subr.bf16.mxu0 %v2494_v61  ;;  %976 = vmatprep.subr.bf16.mxu1 %v2496_v62  ;;  %v2587_v61 = vld [vmem:[#allocation7 + $0x3c0] ss:$16 sps:$4 sm:$0xff]   ;;  %v2590_v62 = vld [vmem:[#allocation7 + $0x3c8] ss:$16 sps:$4 sm:$0xff]  }
  0x64   :  { %891 = vmatpush1.bf16.msra.mxu0 %v2498_v63  ;;  %977 = vmatpush1.bf16.msra.mxu1 %v2499_v0  ;;  %v2595_v63 = vld [vmem:[#allocation7 + $0x3e4] ss:$16 sps:$4 sm:$0xff]   ;;  %v2598_v0 = vld [vmem:[#allocation7 + $0x3ec] ss:$16 sps:$4 sm:$0xff]  }
  0x65   :  { %903 = vmatprep.subr.bf16.mxu0 %v2505_v1  ;;  %989 = vmatprep.subr.bf16.mxu1 %v2508_v2  ;;  %v2593_v1 = vld [vmem:[#allocation7 + $0x3e0] ss:$16 sps:$4 sm:$0xff]   ;;  %v2596_v2 = vld [vmem:[#allocation7 + $0x3e8] ss:$16 sps:$4 sm:$0xff]  }
  0x67   :  { %893 = vmatmul.mubr.bf16.vlgmr.msra.gmra.mrb[0].mxu0 %v2500_v3  ;;  %979 = vmatmul.mubr.bf16.vlgmr.msra.gmra.mrb[0].mxu1 %v2500_v3  ;;  %v2599_v3 = vld [vmem:[#allocation4 + $0x8] ss:$16 sps:$4 sm:$0xff]  }
  0x68   :  { %904 = vmatpush1.bf16.msra.mxu0 %v2503_v4  ;;  %990 = vmatpush1.bf16.msra.mxu1 %v2506_v5  ;;  %v180_v4 = vlaneseq }
  0x69   :  { %905 = vmatprep.subr.bf16.mxu0 %v2511_v6  ;;  %991 = vmatprep.subr.bf16.mxu1 %v2514_v7 }
  0x6a   :  { %935 = vmatprep.mubr.bf16.mxu0 %v2601_v28  ;;  %1021 = vmatprep.mubr.bf16.mxu1 %v2601_v28  ;;  %v181_v5 = vshrl.u32 %v180_v4, 7 }
  0x6c   :  { %906 = vmatpush1.bf16.msra.mxu0 %v2509_v8  ;;  %992 = vmatpush1.bf16.msra.mxu1 %v2512_v9  ;;  %v182_v6 = vsub.s32 0, %v181_v5  ;;  %v190_v7 = vsub.s32 2, %v181_v5  ;;  %v178_v8 = vld [vmem:[%s3253_s2] sm:$0xf]  ;;  %v186_v9 = vsub.s32 1, %v181_v5  ;;  %s2680_s2 = smov [#allocation9]  }
  0x6d   :  { %907 = vmatprep.subr.bf16.mxu0 %v2517_v10  ;;  %993 = vmatprep.subr.bf16.mxu1 %v2520_v11  ;;  %v194_v10 = vsub.s32 3, %v181_v5  ;;  %s2181_s11 = sshll.u32 %s2680_s2, 4  ;;  %s3232_s11 = int_to_ptr.vmem [resolvable:$true] %s2181_s11 }
  0x6e   :  { %v183_v11 = vrot.slane %v178_v8, %v182_v6  ;;  %s2646_s12 = scalar_lea.vmem %s3232_s11, 1024  ;;  %p2651_p3 = scmp.lt.s32.totalorder %s3232_s11, %s3232_s11 }
  0x6f   :  { %p2647_p2 = scmp.ne.s32.totalorder %s3232_s11, %s2646_s12  ;;  %p2652_p4 = scmp.lt.s32.totalorder %s2646_s12, %s2646_s12 }
  0x70   :  { %908 = vmatpush1.bf16.msra.mxu0 %v2515_v12  ;;  %994 = vmatpush1.bf16.msra.mxu1 %v2518_v13  ;;  %v191_v12 = vrot.slane %v178_v8, %v190_v7 }
  0x71   :  { %909 = vmatprep.subr.bf16.mxu0 %v2523_v14  ;;  %995 = vmatprep.subr.bf16.mxu1 %v2526_v15  ;;  %v187_v15 = vrot.slane %v178_v8, %v186_v9  ;;  %p2653_p5 = por %p2652_p4, %p2651_p3 }
  0x73   :  { %p2654_p6 = pnand %p2653_p5, %p2647_p2 }
  0x74   :  { %910 = vmatpush1.bf16.msra.mxu0 %v2521_v16  ;;  %996 = vmatpush1.bf16.msra.mxu1 %v2524_v17  ;;  %v195_v16 = vrot.slane %v178_v8, %v194_v10 }
  0x75   :  { %911 = vmatprep.subr.bf16.mxu0 %v2529_v18  ;;  %997 = vmatprep.subr.bf16.mxu1 %v2532_v19 }
  0x78   :  { %912 = vmatpush1.bf16.msra.mxu0 %v2527_v20  ;;  %998 = vmatpush1.bf16.msra.mxu1 %v2530_v21 }
  0x79   :  { %913 = vmatprep.subr.bf16.mxu0 %v2535_v22  ;;  %999 = vmatprep.subr.bf16.mxu1 %v2538_v23 }
  0x7c   :  { %914 = vmatpush1.bf16.msra.mxu0 %v2533_v24  ;;  %1000 = vmatpush1.bf16.msra.mxu1 %v2536_v25 }
  0x7d   :  { %915 = vmatprep.subr.bf16.mxu0 %v2541_v26  ;;  %1001 = vmatprep.subr.bf16.mxu1 %v2544_v27 }
  0x80   :  { %916 = vmatpush1.bf16.msra.mxu0 %v2539_v29  ;;  %1002 = vmatpush1.bf16.msra.mxu1 %v2542_v30 }
  0x81   :  { %917 = vmatprep.subr.bf16.mxu0 %v2547_v31  ;;  %1003 = vmatprep.subr.bf16.mxu1 %v2550_v32 }
  0x84   :  { %918 = vmatpush1.bf16.msra.mxu0 %v2545_v33  ;;  %1004 = vmatpush1.bf16.msra.mxu1 %v2548_v34 }
  0x85   :  { %919 = vmatprep.subr.bf16.mxu0 %v2553_v35  ;;  %1005 = vmatprep.subr.bf16.mxu1 %v2556_v36 }
  0x88   :  { %920 = vmatpush1.bf16.msra.mxu0 %v2551_v37  ;;  %1006 = vmatpush1.bf16.msra.mxu1 %v2554_v38 }
  0x89   :  { %921 = vmatprep.subr.bf16.mxu0 %v2559_v39  ;;  %1007 = vmatprep.subr.bf16.mxu1 %v2562_v40  ;;  %v2678_v39 = vmov 0  }
  0x8c   :  { %922 = vmatpush1.bf16.msra.mxu0 %v2557_v41  ;;  %1008 = vmatpush1.bf16.msra.mxu1 %v2560_v42 }
  0x8d   :  { %923 = vmatprep.subr.bf16.mxu0 %v2565_v43  ;;  %1009 = vmatprep.subr.bf16.mxu1 %v2568_v44 }
  0x90   :  { %924 = vmatpush1.bf16.msra.mxu0 %v2563_v45  ;;  %1010 = vmatpush1.bf16.msra.mxu1 %v2566_v46 }
  0x91   :  { %925 = vmatprep.subr.bf16.mxu0 %v2571_v47  ;;  %1011 = vmatprep.subr.bf16.mxu1 %v2574_v48 }
  0x94   :  { %926 = vmatpush1.bf16.msra.mxu0 %v2569_v49  ;;  %1012 = vmatpush1.bf16.msra.mxu1 %v2572_v50 }
  0x95   :  { %927 = vmatprep.subr.bf16.mxu0 %v2577_v51  ;;  %1013 = vmatprep.subr.bf16.mxu1 %v2580_v52 }
  0x98   :  { %928 = vmatpush1.bf16.msra.mxu0 %v2575_v53  ;;  %1014 = vmatpush1.bf16.msra.mxu1 %v2578_v54 }
  0x99   :  { %929 = vmatprep.subr.bf16.mxu0 %v2583_v55  ;;  %1015 = vmatprep.subr.bf16.mxu1 %v2586_v56 }
  0x9c   :  { %930 = vmatpush1.bf16.msra.mxu0 %v2581_v57  ;;  %1016 = vmatpush1.bf16.msra.mxu1 %v2584_v58 }
  0x9d   :  { %931 = vmatprep.subr.bf16.mxu0 %v2589_v59  ;;  %1017 = vmatprep.subr.bf16.mxu1 %v2592_v60 }
  0xa0   :  { %932 = vmatpush1.bf16.msra.mxu0 %v2587_v61  ;;  %1018 = vmatpush1.bf16.msra.mxu1 %v2590_v62 }
  0xa1   :  { %933 = vmatprep.subr.bf16.mxu0 %v2595_v63  ;;  %1019 = vmatprep.subr.bf16.mxu1 %v2598_v0 }
  0xa4   :  { %934 = vmatpush1.bf16.msra.mxu0 %v2593_v1  ;;  %1020 = vmatpush1.bf16.msra.mxu1 %v2596_v2 }
  0xa7   :  { %936 = vmatmul.mubr.bf16.vlgmr.msra.gmra.mrb[0].mxu0 %v2599_v3  ;;  %1022 = vmatmul.mubr.bf16.vlgmr.msra.gmra.mrb[0].mxu1 %v2599_v3 }
 0x17a   :  { %v937_v13 = vpop.f32.mrb[0].mxu0  ;;  %v1023_v14 = vpop.f32.mrb[0].mxu1 }
 0x17b   :  { %v939_v17 = vpop.f32.mrb[1].mxu0  ;;  %v1025_v18 = vpop.f32.mrb[1].mxu1  ;;  %v2378_v21 = vadd.f32 %v937_v13, %v183_v11  ;;  %v2382_v22 = vadd.f32 %v1023_v14, %v191_v12 }
 0x17c   :  { %v941_v19 = vpop.f32.mrb[2].mxu0  ;;  %v1027_v20 = vpop.f32.mrb[2].mxu1  ;;  %v2379_v27 = vadd.f32 %v939_v17, %v187_v15  ;;  %v2383_v28 = vadd.f32 %v1025_v18, %v195_v16 }
 0x17d   :  { %v2380_v23 = vadd.f32 %v941_v19, %v183_v11  ;;  %v2384_v24 = vadd.f32 %v1027_v20, %v191_v12  ;;  %v943_v25 = vpop.f32.mrb[3].mxu0  ;;  %v1029_v26 = vpop.f32.mrb[3].mxu1 }
 0x17e   :  { %v2381_v29 = vadd.f32 %v943_v25, %v187_v15  ;;  %v2385_v30 = vadd.f32 %v1029_v26, %v195_v16 }
 0x17f   :  { %v2731_v31 = vpack.c.bf16 %v2380_v23, %v2378_v21  ;;  %v2733_v32 = vpack.c.bf16 %v2384_v24, %v2382_v22 }
 0x180   :  { %v2735_v33 = vpack.c.bf16 %v2381_v29, %v2379_v27  ;;  %v2737_v34 = vpack.c.bf16 %v2385_v30, %v2383_v28 }
 0x182   :  { %v1044_v35 = vmax.bf16 %v2735_v33, %v2731_v31  ;;  %v1045_v36 = vmax.bf16 %v2737_v34, %v2733_v32 }
 0x184   :  { %v1046_v37 = vmax.bf16 %v1045_v36, %v1044_v35 }
 0x186   :  { %1047 = vmax.xlane.bf16.xlu0 %v1046_v37 }
 0x217   :  { %v2743_v38 = vpop.xlane.xlu0 %1047 }
 0x218   :  { %vm1049_vm0 = vcmp.eq.bf16.partialorder %v2731_v31, %v2743_v38  ;;  %vm1050_vm1 = vcmp.eq.bf16.partialorder %v2735_v33, %v2743_v38  ;;  %vm1051_vm2 = vcmp.eq.bf16.partialorder %v2733_v32, %v2743_v38  ;;  %vm1052_vm3 = vcmp.eq.bf16.partialorder %v2737_v34, %v2743_v38 }
 0x219   :  { %v1054_v40 = vsel %vm1050_vm1, 65537, %v2678_v39  ;;  %v1055_v41 = vsel %vm1051_vm2, 65537, %v2678_v39  ;;  %v1056_v42 = vsel %vm1052_vm3, 65537, %v2678_v39  ;;  %v2757_v43 = vsel %vm1049_vm0, -3.0173155e+38, %v2731_v31 }
 0x21a   :  { %v2327_v44 = vcombine.low %v1055_v41, %v1056_v42  ;;  %v2329_v45 = vcombine.high %v1055_v41, %v1056_v42  ;;  %v1151_v46 = vsel %vm1050_vm1, -3.0173155e+38, %v2735_v33  ;;  %v1152_v47 = vsel %vm1051_vm2, -3.0173155e+38, %v2733_v32 }
 0x21b   :  { %v1153_v48 = vsel %vm1052_vm3, -3.0173155e+38, %v2737_v34  ;;  %v1162_v49 = vmax.bf16 %v1151_v46, %v2757_v43  ;;  %v1053_v50 = vsel %vm1049_vm0, 65537, %v2678_v39 }
 0x21c   :  { %vm1070_vm4 = vcmp.ne.s16.totalorder %v2327_v44, 0  ;;  %vm1072_vm5 = vcmp.ne.s16.totalorder %v2329_v45, 0  ;;  %v1163_v51 = vmax.bf16 %v1153_v48, %v1152_v47  ;;  %v2326_v52 = vcombine.low %v1053_v50, %v1054_v40 }
 0x21d   :  { %v2328_v53 = vcombine.high %v1053_v50, %v1054_v40  ;;  %v1074_v54 = vsel %vm1070_vm4, 65537, %v2678_v39  ;;  %v1076_v55 = vsel %vm1072_vm5, 65537, %v2678_v39 }
 0x21e   :  { %v1164_v56 = vmax.bf16 %v1163_v51, %v1162_v49  ;;  %vm1069_vm6 = vcmp.ne.s16.totalorder %v2326_v52, 0  ;;  %v1079_v57 = vunpack.c.l.b16 %v1074_v54  ;;  %v1080_v58 = vunpack.c.h.b16 %v1074_v54 }
 0x21f   :  { %vm1071_vm7 = vcmp.ne.s16.totalorder %v2328_v53, 0  ;;  %v1073_v59 = vsel %vm1069_vm6, 65537, %v2678_v39  ;;  %v1083_v60 = vunpack.c.l.b16 %v1076_v55  ;;  %v1084_v61 = vunpack.c.h.b16 %v1076_v55 }
 0x220   :  { %1165 = vmax.xlane.bf16.xlu0 %v1164_v56  ;;  %v1077_v62 = vunpack.c.l.b16 %v1073_v59  ;;  %v1078_v63 = vunpack.c.h.b16 %v1073_v59  ;;  %vm1087_vm8 = vcmp.ne.s32.totalorder %v1079_v57, 0  ;;  %vm1088_vm9 = vcmp.ne.s32.totalorder %v1080_v58, 0 }
 0x221   :  { %v1095_v0 = vsel %vm1087_vm8, 1, %v2678_v39  ;;  %v1096_v1 = vsel %vm1088_vm9, 1, %v2678_v39  ;;  %v1075_v2 = vsel %vm1071_vm7, 65537, %v2678_v39  ;;  %vm1091_vm10 = vcmp.ne.s32.totalorder %v1083_v60, 0 }
 0x222   :  { %vm1085_vm11 = vcmp.ne.s32.totalorder %v1077_v62, 0  ;;  %vm1086_vm12 = vcmp.ne.s32.totalorder %v1078_v63, 0  ;;  %v1081_v3 = vunpack.c.l.b16 %v1075_v2  ;;  %v1082_v4 = vunpack.c.h.b16 %v1075_v2 }
 0x223   :  { %v1093_v5 = vsel %vm1085_vm11, 1, %v2678_v39  ;;  %v1094_v6 = vsel %vm1086_vm12, 1, %v2678_v39  ;;  %vm1092_vm13 = vcmp.ne.s32.totalorder %v1084_v61, 0  ;;  %v1099_v7 = vsel %vm1091_vm10, 1, %v2678_v39 }
 0x224   :  { %v1101_v8 = vadd.s32 %v1095_v0, %v1093_v5  ;;  %v1102_v9 = vadd.s32 %v1096_v1, %v1094_v6  ;;  %vm1089_vm14 = vcmp.ne.s32.totalorder %v1081_v3, 0  ;;  %vm1090_vm15 = vcmp.ne.s32.totalorder %v1082_v4, 0 }
 0x225   :  { %v1097_v10 = vsel %vm1089_vm14, 1, %v2678_v39  ;;  %v1098_v11 = vsel %vm1090_vm15, 1, %v2678_v39  ;;  %v1100_v12 = vsel %vm1092_vm13, 1, %v2678_v39 }
 0x226   :  { %v2776_v13 = vadd.s32 %v1102_v9, %v1101_v8  ;;  %v1116_v14 = vadd.s32 %v1099_v7, %v1097_v10  ;;  %v1117_v15 = vadd.s32 %v1100_v12, %v1098_v11 }
 0x228   :  { %v2778_v16 = vadd.s32 %v1117_v15, %v1116_v14 }
 0x2b1   :  { %v2780_v17 = vpop.xlane.xlu0 %1165 }
 0x2b2   :  { %vm1167_vm0 = vcmp.eq.bf16.partialorder %v2757_v43, %v2780_v17  ;;  %vm1168_vm1 = vcmp.eq.bf16.partialorder %v1151_v46, %v2780_v17  ;;  %vm1169_vm2 = vcmp.eq.bf16.partialorder %v1152_v47, %v2780_v17  ;;  %vm1170_vm3 = vcmp.eq.bf16.partialorder %v1153_v48, %v2780_v17 }
 0x2b3   :  { %v1172_v18 = vsel %vm1168_vm1, 65537, %v2678_v39  ;;  %v1173_v19 = vsel %vm1169_vm2, 65537, %v2678_v39  ;;  %v1174_v20 = vsel %vm1170_vm3, 65537, %v2678_v39  ;;  %v2791_v21 = vsel %vm1167_vm0, -3.0173155e+38, %v2757_v43 }
 0x2b4   :  { %v2331_v22 = vcombine.low %v1173_v19, %v1174_v20  ;;  %v2333_v23 = vcombine.high %v1173_v19, %v1174_v20  ;;  %v1257_v24 = vsel %vm1168_vm1, -3.0173155e+38, %v1151_v46  ;;  %v1258_v25 = vsel %vm1169_vm2, -3.0173155e+38, %v1152_v47 }
 0x2b5   :  { %v1259_v26 = vsel %vm1170_vm3, -3.0173155e+38, %v1153_v48  ;;  %v1268_v27 = vmax.bf16 %v1257_v24, %v2791_v21  ;;  %v1171_v28 = vsel %vm1167_vm0, 65537, %v2678_v39 }
 0x2b6   :  { %vm1188_vm4 = vcmp.ne.s16.totalorder %v2331_v22, 0  ;;  %vm1190_vm5 = vcmp.ne.s16.totalorder %v2333_v23, 0  ;;  %v1269_v29 = vmax.bf16 %v1259_v26, %v1258_v25  ;;  %v2330_v30 = vcombine.low %v1171_v28, %v1172_v18 }
 0x2b7   :  { %v1192_v35 = vsel %vm1188_vm4, 65537, %v2678_v39  ;;  %v1194_v36 = vsel %vm1190_vm5, 65537, %v2678_v39  ;;  %v2332_v37 = vcombine.high %v1171_v28, %v1172_v18 }
 0x2b8   :  { %v1270_v40 = vmax.bf16 %v1269_v29, %v1268_v27  ;;  %vm1187_vm6 = vcmp.ne.s16.totalorder %v2330_v30, 0  ;;  %v1197_v41 = vunpack.c.l.b16 %v1192_v35  ;;  %v1198_v42 = vunpack.c.h.b16 %v1192_v35 }
 0x2b9   :  { %vm1189_vm7 = vcmp.ne.s16.totalorder %v2332_v37, 0  ;;  %v1191_v43 = vsel %vm1187_vm6, 65537, %v2678_v39  ;;  %v1201_v44 = vunpack.c.l.b16 %v1194_v36  ;;  %v1202_v45 = vunpack.c.h.b16 %v1194_v36 }
 0x2ba   :  { %1271 = vmax.xlane.bf16.xlu1 %v1270_v40  ;;  %v1193_v46 = vsel %vm1189_vm7, 65537, %v2678_v39  ;;  %v1195_v47 = vunpack.c.l.b16 %v1191_v43  ;;  %v1196_v48 = vunpack.c.h.b16 %v1191_v43  ;;  %vm1205_vm8 = vcmp.ne.s32.totalorder %v1197_v41, 0 }
 0x2bb   :  { %vm1206_vm9 = vcmp.ne.s32.totalorder %v1198_v42, 0  ;;  %v1213_v49 = vsel %vm1205_vm8, 1, %v2678_v39  ;;  %v1199_v50 = vunpack.c.l.b16 %v1193_v46  ;;  %v1200_v51 = vunpack.c.h.b16 %v1193_v46 }
 0x2bc   :  { %vm1203_vm10 = vcmp.ne.s32.totalorder %v1195_v47, 0  ;;  %vm1204_vm11 = vcmp.ne.s32.totalorder %v1196_v48, 0  ;;  %v1214_v52 = vsel %vm1206_vm9, 1, %v2678_v39  ;;  %vm1209_vm12 = vcmp.ne.s32.totalorder %v1201_v44, 0 }
 0x2bd   :  { %v1211_v53 = vsel %vm1203_vm10, 1, %v2678_v39  ;;  %v1212_v54 = vsel %vm1204_vm11, 1, %v2678_v39  ;;  %vm1207_vm13 = vcmp.ne.s32.totalorder %v1199_v50, 0  ;;  %vm1208_vm14 = vcmp.ne.s32.totalorder %v1200_v51, 0 }
 0x2be   :  { %v1219_v55 = vadd.s32 %v1213_v49, %v1211_v53  ;;  %v1220_v56 = vadd.s32 %v1214_v52, %v1212_v54  ;;  %vm1210_vm15 = vcmp.ne.s32.totalorder %v1202_v45, 0  ;;  %v1215_v57 = vsel %vm1207_vm13, 1, %v2678_v39 }
 0x2bf   :  { %v1216_v58 = vsel %vm1208_vm14, 1, %v2678_v39  ;;  %v1217_v59 = vsel %vm1209_vm12, 1, %v2678_v39  ;;  %v1218_v60 = vsel %vm1210_vm15, 1, %v2678_v39 }
 0x2c0   :  { %v2807_v61 = vadd.s32 %v1220_v56, %v1219_v55  ;;  %v1234_v62 = vadd.s32 %v1217_v59, %v1215_v57  ;;  %v1235_v63 = vadd.s32 %v1218_v60, %v1216_v58 }
 0x2c2   :  { %v2809_v0 = vadd.s32 %v1235_v63, %v1234_v62 }
 0x34b   :  { %v2811_v1 = vpop.xlane.xlu1 %1271 }
 0x34c   :  { %vm1273_vm0 = vcmp.eq.bf16.partialorder %v2791_v21, %v2811_v1  ;;  %vm1274_vm1 = vcmp.eq.bf16.partialorder %v1257_v24, %v2811_v1  ;;  %vm1275_vm2 = vcmp.eq.bf16.partialorder %v1258_v25, %v2811_v1  ;;  %vm1276_vm3 = vcmp.eq.bf16.partialorder %v1259_v26, %v2811_v1 }
 0x34d   :  { %v1278_v2 = vsel %vm1274_vm1, 65537, %v2678_v39  ;;  %v1279_v3 = vsel %vm1275_vm2, 65537, %v2678_v39  ;;  %v1280_v4 = vsel %vm1276_vm3, 65537, %v2678_v39  ;;  %v2822_v5 = vsel %vm1273_vm0, -3.0173155e+38, %v2791_v21 }
 0x34e   :  { %v2335_v6 = vcombine.low %v1279_v3, %v1280_v4  ;;  %v2337_v7 = vcombine.high %v1279_v3, %v1280_v4  ;;  %v1363_v8 = vsel %vm1274_vm1, -3.0173155e+38, %v1257_v24  ;;  %v1364_v9 = vsel %vm1275_vm2, -3.0173155e+38, %v1258_v25 }
 0x34f   :  { %v1365_v10 = vsel %vm1276_vm3, -3.0173155e+38, %v1259_v26  ;;  %v1374_v11 = vmax.bf16 %v1363_v8, %v2822_v5  ;;  %v1277_v12 = vsel %vm1273_vm0, 65537, %v2678_v39 }
 0x350   :  { %vm1294_vm4 = vcmp.ne.s16.totalorder %v2335_v6, 0  ;;  %vm1296_vm5 = vcmp.ne.s16.totalorder %v2337_v7, 0  ;;  %v1375_v14 = vmax.bf16 %v1365_v10, %v1364_v9  ;;  %v2334_v15 = vcombine.low %v1277_v12, %v1278_v2 }
 0x351   :  { %v2336_v18 = vcombine.high %v1277_v12, %v1278_v2  ;;  %v1298_v19 = vsel %vm1294_vm4, 65537, %v2678_v39  ;;  %v1300_v20 = vsel %vm1296_vm5, 65537, %v2678_v39 }
 0x352   :  { %v1376_v21 = vmax.bf16 %v1375_v14, %v1374_v11  ;;  %vm1293_vm6 = vcmp.ne.s16.totalorder %v2334_v15, 0  ;;  %v1303_v22 = vunpack.c.l.b16 %v1298_v19  ;;  %v1304_v23 = vunpack.c.h.b16 %v1298_v19 }
 0x353   :  { %vm1295_vm7 = vcmp.ne.s16.totalorder %v2336_v18, 0  ;;  %v1297_v24 = vsel %vm1293_vm6, 65537, %v2678_v39  ;;  %v1307_v25 = vunpack.c.l.b16 %v1300_v20  ;;  %v1308_v26 = vunpack.c.h.b16 %v1300_v20 }
 0x354   :  { %1377 = vmax.xlane.bf16.xlu1 %v1376_v21  ;;  %v1301_v27 = vunpack.c.l.b16 %v1297_v24  ;;  %v1302_v28 = vunpack.c.h.b16 %v1297_v24  ;;  %vm1311_vm8 = vcmp.ne.s32.totalorder %v1303_v22, 0  ;;  %vm1312_vm9 = vcmp.ne.s32.totalorder %v1304_v23, 0 }
 0x355   :  { %v1319_v29 = vsel %vm1311_vm8, 1, %v2678_v39  ;;  %v1320_v30 = vsel %vm1312_vm9, 1, %v2678_v39  ;;  %v1299_v35 = vsel %vm1295_vm7, 65537, %v2678_v39  ;;  %vm1315_vm10 = vcmp.ne.s32.totalorder %v1307_v25, 0 }
 0x356   :  { %vm1309_vm11 = vcmp.ne.s32.totalorder %v1301_v27, 0  ;;  %vm1310_vm12 = vcmp.ne.s32.totalorder %v1302_v28, 0  ;;  %v1305_v36 = vunpack.c.l.b16 %v1299_v35  ;;  %v1306_v37 = vunpack.c.h.b16 %v1299_v35 }
 0x357   :  { %v1317_v40 = vsel %vm1309_vm11, 1, %v2678_v39  ;;  %v1318_v41 = vsel %vm1310_vm12, 1, %v2678_v39  ;;  %vm1316_vm13 = vcmp.ne.s32.totalorder %v1308_v26, 0  ;;  %v1323_v42 = vsel %vm1315_vm10, 1, %v2678_v39 }
 0x358   :  { %v1325_v43 = vadd.s32 %v1319_v29, %v1317_v40  ;;  %v1326_v44 = vadd.s32 %v1320_v30, %v1318_v41  ;;  %vm1313_vm14 = vcmp.ne.s32.totalorder %v1305_v36, 0  ;;  %vm1314_vm15 = vcmp.ne.s32.totalorder %v1306_v37, 0 }
 0x359   :  { %v1321_v45 = vsel %vm1313_vm14, 1, %v2678_v39  ;;  %v1322_v46 = vsel %vm1314_vm15, 1, %v2678_v39  ;;  %v1324_v47 = vsel %vm1316_vm13, 1, %v2678_v39 }
 0x35a   :  { %v2838_v48 = vadd.s32 %v1326_v44, %v1325_v43  ;;  %v1340_v49 = vadd.s32 %v1323_v42, %v1321_v45  ;;  %v1341_v50 = vadd.s32 %v1324_v47, %v1322_v46 }
 0x35c   :  { %v2840_v51 = vadd.s32 %v1341_v50, %v1340_v49 }
 0x3e5   :  { %v2842_v52 = vpop.xlane.xlu1 %1377 }
 0x3e6   :  { %vm1379_vm0 = vcmp.eq.bf16.partialorder %v2822_v5, %v2842_v52  ;;  %vm1380_vm1 = vcmp.eq.bf16.partialorder %v1363_v8, %v2842_v52  ;;  %vm1381_vm2 = vcmp.eq.bf16.partialorder %v1364_v9, %v2842_v52  ;;  %vm1382_vm3 = vcmp.eq.bf16.partialorder %v1365_v10, %v2842_v52 }
 0x3e7   :  { %v1384_v53 = vsel %vm1380_vm1, 65537, %v2678_v39  ;;  %v1385_v54 = vsel %vm1381_vm2, 65537, %v2678_v39  ;;  %v1386_v55 = vsel %vm1382_vm3, 65537, %v2678_v39  ;;  %v2853_v56 = vsel %vm1379_vm0, -3.0173155e+38, %v2822_v5 }
 0x3e8   :  { %v2339_v57 = vcombine.low %v1385_v54, %v1386_v55  ;;  %v2341_v58 = vcombine.high %v1385_v54, %v1386_v55  ;;  %v1469_v59 = vsel %vm1380_vm1, -3.0173155e+38, %v1363_v8  ;;  %v1470_v60 = vsel %vm1381_vm2, -3.0173155e+38, %v1364_v9 }
 0x3e9   :  { %v1471_v62 = vsel %vm1382_vm3, -3.0173155e+38, %v1365_v10  ;;  %v1480_v63 = vmax.bf16 %v1469_v59, %v2853_v56  ;;  %v1383_v2 = vsel %vm1379_vm0, 65537, %v2678_v39 }
 0x3ea   :  { %vm1400_vm4 = vcmp.ne.s16.totalorder %v2339_v57, 0  ;;  %vm1402_vm5 = vcmp.ne.s16.totalorder %v2341_v58, 0  ;;  %v1481_v3 = vmax.bf16 %v1471_v62, %v1470_v60  ;;  %v2338_v4 = vcombine.low %v1383_v2, %v1384_v53 }
 0x3eb   :  { %v2340_v6 = vcombine.high %v1383_v2, %v1384_v53  ;;  %v1404_v7 = vsel %vm1400_vm4, 65537, %v2678_v39  ;;  %v1406_v11 = vsel %vm1402_vm5, 65537, %v2678_v39 }
 0x3ec   :  { %v1482_v5 = vmax.bf16 %v1481_v3, %v1480_v63  ;;  %vm1399_vm6 = vcmp.ne.s16.totalorder %v2338_v4, 0  ;;  %v1409_v12 = vunpack.c.l.b16 %v1404_v7  ;;  %v1410_v14 = vunpack.c.h.b16 %v1404_v7 }
 0x3ed   :  { %vm1401_vm7 = vcmp.ne.s16.totalorder %v2340_v6, 0  ;;  %v1403_v8 = vsel %vm1399_vm6, 65537, %v2678_v39  ;;  %v1413_v9 = vunpack.c.l.b16 %v1406_v11  ;;  %v1414_v10 = vunpack.c.h.b16 %v1406_v11 }
 0x3ee   :  { %1483 = vmax.xlane.bf16.xlu0 %v1482_v5  ;;  %v1407_v15 = vunpack.c.l.b16 %v1403_v8  ;;  %v1408_v18 = vunpack.c.h.b16 %v1403_v8  ;;  %vm1417_vm8 = vcmp.ne.s32.totalorder %v1409_v12, 0  ;;  %vm1418_vm9 = vcmp.ne.s32.totalorder %v1410_v14, 0 }
 0x3ef   :  { %v1425_v19 = vsel %vm1417_vm8, 1, %v2678_v39  ;;  %v1426_v20 = vsel %vm1418_vm9, 1, %v2678_v39  ;;  %v1405_v21 = vsel %vm1401_vm7, 65537, %v2678_v39  ;;  %vm1421_vm10 = vcmp.ne.s32.totalorder %v1413_v9, 0 }
 0x3f0   :  { %vm1415_vm11 = vcmp.ne.s32.totalorder %v1407_v15, 0  ;;  %vm1416_vm12 = vcmp.ne.s32.totalorder %v1408_v18, 0  ;;  %v1411_v22 = vunpack.c.l.b16 %v1405_v21  ;;  %v1412_v23 = vunpack.c.h.b16 %v1405_v21 }
 0x3f1   :  { %v1423_v24 = vsel %vm1415_vm11, 1, %v2678_v39  ;;  %v1424_v25 = vsel %vm1416_vm12, 1, %v2678_v39  ;;  %vm1422_vm13 = vcmp.ne.s32.totalorder %v1414_v10, 0  ;;  %v1429_v26 = vsel %vm1421_vm10, 1, %v2678_v39 }
 0x3f2   :  { %v1431_v27 = vadd.s32 %v1425_v19, %v1423_v24  ;;  %v1432_v28 = vadd.s32 %v1426_v20, %v1424_v25  ;;  %vm1419_vm14 = vcmp.ne.s32.totalorder %v1411_v22, 0  ;;  %vm1420_vm15 = vcmp.ne.s32.totalorder %v1412_v23, 0 }
 0x3f3   :  { %v1427_v29 = vsel %vm1419_vm14, 1, %v2678_v39  ;;  %v1428_v30 = vsel %vm1420_vm15, 1, %v2678_v39  ;;  %v1430_v35 = vsel %vm1422_vm13, 1, %v2678_v39 }
 0x3f4   :  { %v2869_v36 = vadd.s32 %v1432_v28, %v1431_v27  ;;  %v1446_v37 = vadd.s32 %v1429_v26, %v1427_v29  ;;  %v1447_v40 = vadd.s32 %v1430_v35, %v1428_v30 }
 0x3f6   :  { %v2871_v41 = vadd.s32 %v1447_v40, %v1446_v37 }
 0x47f   :  { %v2873_v42 = vpop.xlane.xlu0 %1483 }
 0x480   :  { %vm1485_vm0 = vcmp.eq.bf16.partialorder %v2853_v56, %v2873_v42  ;;  %vm1486_vm1 = vcmp.eq.bf16.partialorder %v1469_v59, %v2873_v42  ;;  %vm1487_vm2 = vcmp.eq.bf16.partialorder %v1470_v60, %v2873_v42  ;;  %vm1488_vm3 = vcmp.eq.bf16.partialorder %v1471_v62, %v2873_v42 }
 0x481   :  { %v1490_v43 = vsel %vm1486_vm1, 65537, %v2678_v39  ;;  %v1491_v44 = vsel %vm1487_vm2, 65537, %v2678_v39  ;;  %v1492_v45 = vsel %vm1488_vm3, 65537, %v2678_v39  ;;  %v2884_v46 = vsel %vm1485_vm0, -3.0173155e+38, %v2853_v56 }
 0x482   :  { %v2343_v47 = vcombine.low %v1491_v44, %v1492_v45  ;;  %v2345_v49 = vcombine.high %v1491_v44, %v1492_v45  ;;  %v1575_v50 = vsel %vm1486_vm1, -3.0173155e+38, %v1469_v59  ;;  %v1576_v53 = vsel %vm1487_vm2, -3.0173155e+38, %v1470_v60 }
 0x483   :  { %v1577_v54 = vsel %vm1488_vm3, -3.0173155e+38, %v1471_v62  ;;  %v1586_v55 = vmax.bf16 %v1575_v50, %v2884_v46  ;;  %v1489_v57 = vsel %vm1485_vm0, 65537, %v2678_v39 }
 0x484   :  { %vm1506_vm4 = vcmp.ne.s16.totalorder %v2343_v47, 0  ;;  %vm1508_vm5 = vcmp.ne.s16.totalorder %v2345_v49, 0  ;;  %v1587_v58 = vmax.bf16 %v1577_v54, %v1576_v53  ;;  %v2342_v63 = vcombine.low %v1489_v57, %v1490_v43 }
 0x485   :  { %v2344_v2 = vcombine.high %v1489_v57, %v1490_v43  ;;  %v1510_v3 = vsel %vm1506_vm4, 65537, %v2678_v39  ;;  %v1512_v4 = vsel %vm1508_vm5, 65537, %v2678_v39 }
 0x486   :  { %v1588_v56 = vmax.bf16 %v1587_v58, %v1586_v55  ;;  %vm1505_vm6 = vcmp.ne.s16.totalorder %v2342_v63, 0  ;;  %v1515_v6 = vunpack.c.l.b16 %v1510_v3  ;;  %v1516_v7 = vunpack.c.h.b16 %v1510_v3 }
 0x487   :  { %vm1507_vm7 = vcmp.ne.s16.totalorder %v2344_v2, 0  ;;  %v1509_v59 = vsel %vm1505_vm6, 65537, %v2678_v39  ;;  %v1519_v60 = vunpack.c.l.b16 %v1512_v4  ;;  %v1520_v62 = vunpack.c.h.b16 %v1512_v4 }
 0x488   :  { %1589 = vmax.xlane.bf16.xlu1 %v1588_v56  ;;  %v1513_v11 = vunpack.c.l.b16 %v1509_v59  ;;  %v1514_v5 = vunpack.c.h.b16 %v1509_v59  ;;  %vm1523_vm8 = vcmp.ne.s32.totalorder %v1515_v6, 0  ;;  %vm1524_vm9 = vcmp.ne.s32.totalorder %v1516_v7, 0 }
 0x489   :  { %v1531_v12 = vsel %vm1523_vm8, 1, %v2678_v39  ;;  %v1532_v14 = vsel %vm1524_vm9, 1, %v2678_v39  ;;  %v1511_v8 = vsel %vm1507_vm7, 65537, %v2678_v39  ;;  %vm1527_vm10 = vcmp.ne.s32.totalorder %v1519_v60, 0 }
 0x48a   :  { %vm1521_vm11 = vcmp.ne.s32.totalorder %v1513_v11, 0  ;;  %vm1522_vm12 = vcmp.ne.s32.totalorder %v1514_v5, 0  ;;  %v1517_v9 = vunpack.c.l.b16 %v1511_v8  ;;  %v1518_v10 = vunpack.c.h.b16 %v1511_v8 }
 0x48b   :  { %v1529_v15 = vsel %vm1521_vm11, 1, %v2678_v39  ;;  %v1530_v18 = vsel %vm1522_vm12, 1, %v2678_v39  ;;  %vm1528_vm13 = vcmp.ne.s32.totalorder %v1520_v62, 0  ;;  %v1535_v19 = vsel %vm1527_vm10, 1, %v2678_v39 }
 0x48c   :  { %v1537_v20 = vadd.s32 %v1531_v12, %v1529_v15  ;;  %v1538_v21 = vadd.s32 %v1532_v14, %v1530_v18  ;;  %vm1525_vm14 = vcmp.ne.s32.totalorder %v1517_v9, 0  ;;  %vm1526_vm15 = vcmp.ne.s32.totalorder %v1518_v10, 0 }
 0x48d   :  { %v1533_v22 = vsel %vm1525_vm14, 1, %v2678_v39  ;;  %v1534_v23 = vsel %vm1526_vm15, 1, %v2678_v39  ;;  %v1536_v24 = vsel %vm1528_vm13, 1, %v2678_v39 }
 0x48e   :  { %v2900_v25 = vadd.s32 %v1538_v21, %v1537_v20  ;;  %v1552_v26 = vadd.s32 %v1535_v19, %v1533_v22  ;;  %v1553_v27 = vadd.s32 %v1536_v24, %v1534_v23 }
 0x490   :  { %v2902_v28 = vadd.s32 %v1553_v27, %v1552_v26 }
 0x519   :  { %v2904_v29 = vpop.xlane.xlu1 %1589 }
 0x51a   :  { %vm1591_vm0 = vcmp.eq.bf16.partialorder %v2884_v46, %v2904_v29  ;;  %vm1592_vm1 = vcmp.eq.bf16.partialorder %v1575_v50, %v2904_v29  ;;  %vm1593_vm2 = vcmp.eq.bf16.partialorder %v1576_v53, %v2904_v29  ;;  %vm1594_vm3 = vcmp.eq.bf16.partialorder %v1577_v54, %v2904_v29 }
 0x51b   :  { %v1596_v30 = vsel %vm1592_vm1, 65537, %v2678_v39  ;;  %v1597_v35 = vsel %vm1593_vm2, 65537, %v2678_v39  ;;  %v1598_v37 = vsel %vm1594_vm3, 65537, %v2678_v39  ;;  %v2915_v40 = vsel %vm1591_vm0, -3.0173155e+38, %v2884_v46 }
 0x51c   :  { %v2347_v43 = vcombine.low %v1597_v35, %v1598_v37  ;;  %v2349_v44 = vcombine.high %v1597_v35, %v1598_v37  ;;  %v1681_v45 = vsel %vm1592_vm1, -3.0173155e+38, %v1575_v50  ;;  %v1682_v47 = vsel %vm1593_vm2, -3.0173155e+38, %v1576_v53 }
 0x51d   :  { %v1683_v49 = vsel %vm1594_vm3, -3.0173155e+38, %v1577_v54  ;;  %v1692_v55 = vmax.bf16 %v1681_v45, %v2915_v40  ;;  %v1595_v57 = vsel %vm1591_vm0, 65537, %v2678_v39 }
 0x51e   :  { %vm1612_vm4 = vcmp.ne.s16.totalorder %v2347_v43, 0  ;;  %vm1614_vm5 = vcmp.ne.s16.totalorder %v2349_v44, 0  ;;  %v1693_v58 = vmax.bf16 %v1683_v49, %v1682_v47  ;;  %v2346_v63 = vcombine.low %v1595_v57, %v1596_v30 }
 0x51f   :  { %v2348_v2 = vcombine.high %v1595_v57, %v1596_v30  ;;  %v1616_v3 = vsel %vm1612_vm4, 65537, %v2678_v39  ;;  %v1618_v4 = vsel %vm1614_vm5, 65537, %v2678_v39 }
 0x520   :  { %v1694_v46 = vmax.bf16 %v1693_v58, %v1692_v55  ;;  %vm1611_vm6 = vcmp.ne.s16.totalorder %v2346_v63, 0  ;;  %v1621_v56 = vunpack.c.l.b16 %v1616_v3  ;;  %v1622_v6 = vunpack.c.h.b16 %v1616_v3 }
 0x521   :  { %vm1613_vm7 = vcmp.ne.s16.totalorder %v2348_v2, 0  ;;  %v1615_v50 = vsel %vm1611_vm6, 65537, %v2678_v39  ;;  %v1625_v53 = vunpack.c.l.b16 %v1618_v4  ;;  %v1626_v54 = vunpack.c.h.b16 %v1618_v4 }
 0x522   :  { %1695 = vmax.xlane.bf16.xlu0 %v1694_v46  ;;  %v1619_v7 = vunpack.c.l.b16 %v1615_v50  ;;  %v1620_v59 = vunpack.c.h.b16 %v1615_v50  ;;  %vm1629_vm8 = vcmp.ne.s32.totalorder %v1621_v56, 0  ;;  %vm1630_vm9 = vcmp.ne.s32.totalorder %v1622_v6, 0 }
 0x523   :  { %v1637_v60 = vsel %vm1629_vm8, 1, %v2678_v39  ;;  %v1638_v62 = vsel %vm1630_vm9, 1, %v2678_v39  ;;  %v1617_v11 = vsel %vm1613_vm7, 65537, %v2678_v39  ;;  %vm1633_vm10 = vcmp.ne.s32.totalorder %v1625_v53, 0 }
 0x524   :  { %vm1627_vm11 = vcmp.ne.s32.totalorder %v1619_v7, 0  ;;  %vm1628_vm12 = vcmp.ne.s32.totalorder %v1620_v59, 0  ;;  %v1623_v5 = vunpack.c.l.b16 %v1617_v11  ;;  %v1624_v12 = vunpack.c.h.b16 %v1617_v11 }
 0x525   :  { %v1635_v14 = vsel %vm1627_vm11, 1, %v2678_v39  ;;  %v1636_v8 = vsel %vm1628_vm12, 1, %v2678_v39  ;;  %vm1634_vm13 = vcmp.ne.s32.totalorder %v1626_v54, 0  ;;  %v1641_v9 = vsel %vm1633_vm10, 1, %v2678_v39 }
 0x526   :  { %v1643_v10 = vadd.s32 %v1637_v60, %v1635_v14  ;;  %v1644_v15 = vadd.s32 %v1638_v62, %v1636_v8  ;;  %vm1631_vm14 = vcmp.ne.s32.totalorder %v1623_v5, 0  ;;  %vm1632_vm15 = vcmp.ne.s32.totalorder %v1624_v12, 0 }
 0x527   :  { %v1639_v18 = vsel %vm1631_vm14, 1, %v2678_v39  ;;  %v1640_v19 = vsel %vm1632_vm15, 1, %v2678_v39  ;;  %v1642_v20 = vsel %vm1634_vm13, 1, %v2678_v39 }
 0x528   :  { %v2931_v21 = vadd.s32 %v1644_v15, %v1643_v10  ;;  %v1658_v22 = vadd.s32 %v1641_v9, %v1639_v18  ;;  %v1659_v23 = vadd.s32 %v1642_v20, %v1640_v19 }
 0x52a   :  { %v2933_v24 = vadd.s32 %v1659_v23, %v1658_v22 }
 0x5b3   :  { %v2935_v26 = vpop.xlane.xlu0 %1695 }
 0x5b4   :  { %vm1697_vm0 = vcmp.eq.bf16.partialorder %v2915_v40, %v2935_v26  ;;  %vm1698_vm1 = vcmp.eq.bf16.partialorder %v1681_v45, %v2935_v26  ;;  %vm1699_vm2 = vcmp.eq.bf16.partialorder %v1682_v47, %v2935_v26  ;;  %vm1700_vm3 = vcmp.eq.bf16.partialorder %v1683_v49, %v2935_v26 }
 0x5b5   :  { %v1702_v27 = vsel %vm1698_vm1, 65537, %v2678_v39  ;;  %v1703_v30 = vsel %vm1699_vm2, 65537, %v2678_v39  ;;  %v1704_v35 = vsel %vm1700_vm3, 65537, %v2678_v39  ;;  %v2946_v37 = vsel %vm1697_vm0, -3.0173155e+38, %v2915_v40 }
 0x5b6   :  { %v2351_v43 = vcombine.low %v1703_v30, %v1704_v35  ;;  %v2353_v44 = vcombine.high %v1703_v30, %v1704_v35  ;;  %v1787_v55 = vsel %vm1698_vm1, -3.0173155e+38, %v1681_v45  ;;  %v1788_v57 = vsel %vm1699_vm2, -3.0173155e+38, %v1682_v47 }
 0x5b7   :  { %v1789_v58 = vsel %vm1700_vm3, -3.0173155e+38, %v1683_v49  ;;  %v1798_v63 = vmax.bf16 %v1787_v55, %v2946_v37  ;;  %v1701_v2 = vsel %vm1697_vm0, 65537, %v2678_v39 }
 0x5b8   :  { %vm1718_vm4 = vcmp.ne.s16.totalorder %v2351_v43, 0  ;;  %vm1720_vm5 = vcmp.ne.s16.totalorder %v2353_v44, 0  ;;  %v1799_v3 = vmax.bf16 %v1789_v58, %v1788_v57  ;;  %v2350_v4 = vcombine.low %v1701_v2, %v1702_v27 }
 0x5b9   :  { %v2352_v46 = vcombine.high %v1701_v2, %v1702_v27  ;;  %v1722_v56 = vsel %vm1718_vm4, 65537, %v2678_v39  ;;  %v1724_v6 = vsel %vm1720_vm5, 65537, %v2678_v39 }
 0x5ba   :  { %v1800_v40 = vmax.bf16 %v1799_v3, %v1798_v63  ;;  %vm1717_vm6 = vcmp.ne.s16.totalorder %v2350_v4, 0  ;;  %v1727_v50 = vunpack.c.l.b16 %v1722_v56  ;;  %v1728_v53 = vunpack.c.h.b16 %v1722_v56 }
 0x5bb   :  { %vm1719_vm7 = vcmp.ne.s16.totalorder %v2352_v46, 0  ;;  %v1721_v45 = vsel %vm1717_vm6, 65537, %v2678_v39  ;;  %v1731_v47 = vunpack.c.l.b16 %v1724_v6  ;;  %v1732_v49 = vunpack.c.h.b16 %v1724_v6 }
 0x5bc   :  { %1801 = vmax.xlane.bf16.xlu1 %v1800_v40  ;;  %v1725_v54 = vunpack.c.l.b16 %v1721_v45  ;;  %v1726_v7 = vunpack.c.h.b16 %v1721_v45  ;;  %vm1735_vm8 = vcmp.ne.s32.totalorder %v1727_v50, 0  ;;  %vm1736_vm9 = vcmp.ne.s32.totalorder %v1728_v53, 0 }
 0x5bd   :  { %v1743_v59 = vsel %vm1735_vm8, 1, %v2678_v39  ;;  %v1744_v60 = vsel %vm1736_vm9, 1, %v2678_v39  ;;  %v1723_v62 = vsel %vm1719_vm7, 65537, %v2678_v39  ;;  %vm1739_vm10 = vcmp.ne.s32.totalorder %v1731_v47, 0 }
 0x5be   :  { %vm1733_vm11 = vcmp.ne.s32.totalorder %v1725_v54, 0  ;;  %vm1734_vm12 = vcmp.ne.s32.totalorder %v1726_v7, 0  ;;  %v1729_v11 = vunpack.c.l.b16 %v1723_v62  ;;  %v1730_v5 = vunpack.c.h.b16 %v1723_v62 }
 0x5bf   :  { %v1741_v12 = vsel %vm1733_vm11, 1, %v2678_v39  ;;  %v1742_v14 = vsel %vm1734_vm12, 1, %v2678_v39  ;;  %vm1740_vm13 = vcmp.ne.s32.totalorder %v1732_v49, 0  ;;  %v1747_v8 = vsel %vm1739_vm10, 1, %v2678_v39 }
 0x5c0   :  { %v1749_v9 = vadd.s32 %v1743_v59, %v1741_v12  ;;  %v1750_v10 = vadd.s32 %v1744_v60, %v1742_v14  ;;  %vm1737_vm14 = vcmp.ne.s32.totalorder %v1729_v11, 0  ;;  %vm1738_vm15 = vcmp.ne.s32.totalorder %v1730_v5, 0 }
 0x5c1   :  { %v1745_v15 = vsel %vm1737_vm14, 1, %v2678_v39  ;;  %v1746_v18 = vsel %vm1738_vm15, 1, %v2678_v39  ;;  %v1748_v19 = vsel %vm1740_vm13, 1, %v2678_v39  ;;  %v1223_v11 = vshrl.u32 %v2807_v61, 16 }
 0x5c2   :  { %v2962_v20 = vadd.s32 %v1750_v10, %v1749_v9  ;;  %v1764_v22 = vadd.s32 %v1747_v8, %v1745_v15  ;;  %v1765_v23 = vadd.s32 %v1748_v19, %v1746_v18  ;;  %v1104_v9 = vand.u32 65535, %v2776_v13 }
 0x5c3   :  { %v1225_v8 = vcvt.s32.f32 %v1223_v11  ;;  %v1222_v15 = vand.u32 65535, %v2807_v61  ;;  %v1329_v19 = vshrl.u32 %v2838_v48, 16 }
 0x5c4   :  { %v2964_v27 = vadd.s32 %v1765_v23, %v1764_v22  ;;  %v1106_v10 = vcvt.s32.f32 %v1104_v9  ;;  %v1328_v23 = vand.u32 65535, %v2838_v48 }
 0x5c5   :  { %v1224_v18 = vcvt.s32.f32 %v1222_v15  ;;  %v1331_v22 = vcvt.s32.f32 %v1329_v19 }
 0x64d   :  { %v2966_v30 = vpop.xlane.xlu1 %1801 }
 0x64e   :  { %vm1803_vm0 = vcmp.eq.bf16.partialorder %v2946_v37, %v2966_v30  ;;  %vm1804_vm1 = vcmp.eq.bf16.partialorder %v1787_v55, %v2966_v30  ;;  %vm1805_vm2 = vcmp.eq.bf16.partialorder %v1788_v57, %v2966_v30  ;;  %vm1806_vm3 = vcmp.eq.bf16.partialorder %v1789_v58, %v2966_v30 }
 0x64f   :  { %v1809_v35 = vsel %vm1805_vm2, 65537, %v2678_v39  ;;  %v1810_v43 = vsel %vm1806_vm3, 65537, %v2678_v39  ;;  %v2976_v44 = vsel %vm1803_vm0, -3.0173155e+38, %v2946_v37  ;;  %v1808_v63 = vsel %vm1804_vm1, 65537, %v2678_v39 }
 0x650   :  { %v2357_v2 = vcombine.high %v1809_v35, %v1810_v43  ;;  %v2979_v3 = vsel %vm1804_vm1, -3.0173155e+38, %v1787_v55  ;;  %v2981_v4 = vsel %vm1805_vm2, -3.0173155e+38, %v1788_v57  ;;  %v2983_v46 = vsel %vm1806_vm3, -3.0173155e+38, %v1789_v58 }
 0x651   :  { %v1904_v56 = vmax.bf16 %v2979_v3, %v2976_v44  ;;  %v1807_v6 = vsel %vm1803_vm0, 65537, %v2678_v39  ;;  %v1905_v40 = vmax.bf16 %v2983_v46, %v2981_v4  ;;  %v1105_v58 = vshrl.u32 %v2776_v13, 16 }
 0x652   :  { %vm1826_vm4 = vcmp.ne.s16.totalorder %v2357_v2, 0  ;;  %v2356_v37 = vcombine.high %v1807_v6, %v1808_v63  ;;  %v1330_v2 = vcvt.s32.f32 %v1328_v23 }
 0x653   :  { %v1830_v50 = vsel %vm1826_vm4, 65537, %v2678_v39  ;;  %v1906_v53 = vmax.bf16 %v1905_v40, %v1904_v56  ;;  %v1107_v62 = vcvt.s32.f32 %v1105_v58  ;;  %v1435_v56 = vshrl.u32 %v2869_v36, 16 }
 0x654   :  { %vm1825_vm5 = vcmp.ne.s16.totalorder %v2356_v37, 0  ;;  %v1837_v55 = vunpack.c.l.b16 %v1830_v50  ;;  %v1838_v45 = vunpack.c.h.b16 %v1830_v50  ;;  %v2355_v40 = vcombine.low %v1809_v35, %v1810_v43 }
 0x655   :  { %1907 = vmax.xlane.bf16.xlu0 %v1906_v53  ;;  %v1829_v57 = vsel %vm1825_vm5, 65537, %v2678_v39  ;;  %v2354_v37 = vcombine.low %v1807_v6, %v1808_v63  ;;  %v1437_v13 = vcvt.s32.f32 %v1435_v56  ;;  %v1434_v50 = vand.u32 65535, %v2869_v36 }
 0x656   :  { %vm1845_vm6 = vcmp.ne.s32.totalorder %v1837_v55, 0  ;;  %v1835_v47 = vunpack.c.l.b16 %v1829_v57  ;;  %v1836_v49 = vunpack.c.h.b16 %v1829_v57  ;;  %vm1846_vm7 = vcmp.ne.s32.totalorder %v1838_v45, 0 }
 0x657   :  { %v1853_v54 = vsel %vm1845_vm6, 1, %v2678_v39  ;;  %v1854_v60 = vsel %vm1846_vm7, 1, %v2678_v39  ;;  %vm1824_vm10 = vcmp.ne.s16.totalorder %v2355_v40, 0  ;;  %vm1823_vm11 = vcmp.ne.s16.totalorder %v2354_v37, 0 }
 0x658   :  { %vm1843_vm8 = vcmp.ne.s32.totalorder %v1835_v47, 0  ;;  %vm1844_vm9 = vcmp.ne.s32.totalorder %v1836_v49, 0  ;;  %v1436_v61 = vcvt.s32.f32 %v1434_v50  ;;  %v1541_v53 = vshrl.u32 %v2900_v25, 16 }
 0x659   :  { %v1851_v7 = vsel %vm1843_vm8, 1, %v2678_v39  ;;  %v1852_v59 = vsel %vm1844_vm9, 1, %v2678_v39  ;;  %v1827_v55 = vsel %vm1823_vm11, 65537, %v2678_v39  ;;  %v1828_v48 = vsel %vm1824_vm10, 65537, %v2678_v39 }
 0x65a   :  { %v1870_v5 = vadd.s32 %v1853_v54, %v1851_v7  ;;  %v1871_v12 = vadd.s32 %v1854_v60, %v1852_v59  ;;  %v1543_v45 = vcvt.s32.f32 %v1541_v53  ;;  %v1540_v57 = vand.u32 65535, %v2900_v25 }
 0x65b   :  { %v1831_v35 = vunpack.c.l.b16 %v1827_v55  ;;  %v1832_v43 = vunpack.c.h.b16 %v1827_v55  ;;  %v1833_v63 = vunpack.c.l.b16 %v1828_v48  ;;  %v1834_v6 = vunpack.c.h.b16 %v1828_v48 }
 0x65c   :  { %v2998_v14 = vadd.s32 %v1871_v12, %v1870_v5  ;;  %v1542_v36 = vcvt.s32.f32 %v1540_v57  ;;  %v1647_v58 = vshrl.u32 %v2931_v21, 16  ;;  %v1646_v49 = vand.u32 65535, %v2931_v21 }
 0x65d   :  { %1110 = vadd.xlane.f32.xlu0 %v1107_v62  ;;  %vm1839_vm12 = vcmp.ne.s32.totalorder %v1831_v35, 0  ;;  %vm1840_vm13 = vcmp.ne.s32.totalorder %v1832_v43, 0  ;;  %vm1841_vm14 = vcmp.ne.s32.totalorder %v1833_v63, 0  ;;  %vm1842_vm15 = vcmp.ne.s32.totalorder %v1834_v6, 0 }
 0x65e   :  { %v1649_v47 = vcvt.s32.f32 %v1647_v58  ;;  %v1847_v54 = vsel %vm1839_vm12, 1, %v2678_v39  ;;  %v1848_v25 = vsel %vm1840_vm13, 1, %v2678_v39  ;;  %v1849_v7 = vsel %vm1841_vm14, 1, %v2678_v39 }
 0x65f   :  { %v1850_v59 = vsel %vm1842_vm15, 1, %v2678_v39  ;;  %v1648_v60 = vcvt.s32.f32 %v1646_v49  ;;  %v1753_v62 = vshrl.u32 %v2962_v20, 16  ;;  %v1855_v11 = vadd.s32 %v1849_v7, %v1847_v54 }
 0x660   :  { %v1856_v5 = vadd.s32 %v1850_v59, %v1848_v25  ;;  %v1120_v43 = vshrl.u32 %v2778_v16, 16  ;;  %v1238_v25 = vshrl.u32 %v2809_v0, 16 }
 0x661   :  { %1228 = vadd.xlane.f32.xlu0 %v1225_v8  ;;  %v1755_v12 = vcvt.s32.f32 %v1753_v62  ;;  %v1752_v8 = vand.u32 65535, %v2962_v20  ;;  %v1119_v62 = vand.u32 65535, %v2778_v16  ;;  %v1450_v16 = vshrl.u32 %v2871_v41, 16 }
 0x662   :  { %v1857_v9 = vadd.s32 %v1856_v5, %v1855_v11  ;;  %v1122_v54 = vcvt.s32.f32 %v1120_v43  ;;  %v1768_v43 = vshrl.u32 %v2964_v27, 16 }
 0x663   :  { %v1754_v21 = vcvt.s32.f32 %v1752_v8  ;;  %v1237_v8 = vand.u32 65535, %v2809_v0 }
 0x665   :  { %1108 = vadd.xlane.f32.xlu0 %v1106_v10  ;;  %v1859_v10 = vshrl.u32 %v1857_v9, 16 }
 0x667   :  { %v1861_v15 = vcvt.s32.f32 %v1859_v10  ;;  %v1344_v10 = vshrl.u32 %v2840_v51, 16 }
 0x669   :  { %1226 = vadd.xlane.f32.xlu0 %v1224_v18  ;;  %v1858_v18 = vand.u32 65535, %v1857_v9 }
 0x66b   :  { %v1860_v19 = vcvt.s32.f32 %v1858_v18  ;;  %v1343_v18 = vand.u32 65535, %v2840_v51  ;;  %v1555_v51 = vand.u32 65535, %v2902_v28 }
 0x66d   :  { %1334 = vadd.xlane.f32.xlu0 %v1331_v22 }
 0x671   :  { %1332 = vadd.xlane.f32.xlu0 %v1330_v2 }
 0x675   :  { %1440 = vadd.xlane.f32.xlu0 %v1437_v13 }
 0x679   :  { %1438 = vadd.xlane.f32.xlu0 %v1436_v61 }
 0x67d   :  { %1546 = vadd.xlane.f32.xlu0 %v1543_v45 }
 0x681   :  { %1544 = vadd.xlane.f32.xlu0 %v1542_v36 }
 0x685   :  { %1652 = vadd.xlane.f32.xlu0 %v1649_v47 }
 0x689   :  { %1650 = vadd.xlane.f32.xlu0 %v1648_v60  ;;  %v1240_v60 = vcvt.s32.f32 %v1238_v25 }
 0x68d   :  { %1758 = vadd.xlane.f32.xlu0 %v1755_v12  ;;  %v1121_v12 = vcvt.s32.f32 %v1119_v62 }
 0x691   :  { %1756 = vadd.xlane.f32.xlu0 %v1754_v21  ;;  %v1239_v21 = vcvt.s32.f32 %v1237_v8 }
 0x695   :  { %1864 = vadd.xlane.f32.xlu0 %v1861_v15  ;;  %v1346_v15 = vcvt.s32.f32 %v1344_v10 }
 0x699   :  { %1862 = vadd.xlane.f32.xlu0 %v1860_v19  ;;  %v1345_v19 = vcvt.s32.f32 %v1343_v18 }
 0x6e6   :  { %v3018_v22 = vpop.xlane.xlu0 %1907 }
 0x6e7   :  { %vm1909_vm0 = vcmp.eq.bf16.partialorder %v2976_v44, %v3018_v22  ;;  %vm1910_vm1 = vcmp.eq.bf16.partialorder %v2979_v3, %v3018_v22  ;;  %vm1911_vm2 = vcmp.eq.bf16.partialorder %v2981_v4, %v3018_v22  ;;  %vm1912_vm3 = vcmp.eq.bf16.partialorder %v2983_v46, %v3018_v22 }
 0x6e8   :  { %v3029_v20 = vsel %vm1911_vm2, 65537, %v2678_v39  ;;  %v3032_v23 = vsel %vm1912_vm3, 65537, %v2678_v39  ;;  %v3035_v2 = vsel %vm1909_vm0, -3.0173155e+38, %v2976_v44  ;;  %v3038_v56 = vsel %vm1910_vm1, 65537, %v2678_v39 }
 0x6e9   :  { %v2359_v40 = vcombine.low %v3029_v20, %v3032_v23  ;;  %v3043_v37 = vsel %vm1910_vm1, -3.0173155e+38, %v2979_v3  ;;  %v3046_v13 = vsel %vm1911_vm2, -3.0173155e+38, %v2981_v4  ;;  %v3049_v50 = vsel %vm1912_vm3, -3.0173155e+38, %v2983_v46 }
 0x6ea   :  { %v2010_v61 = vmax.bf16 %v3043_v37, %v3035_v2  ;;  %v1913_v44 = vsel %vm1909_vm0, 65537, %v2678_v39  ;;  %v2011_v53 = vmax.bf16 %v3049_v50, %v3046_v13 }
 0x6eb   :  { %vm1930_vm4 = vcmp.ne.s16.totalorder %v2359_v40, 0  ;;  %v2358_v3 = vcombine.low %v1913_v44, %v3038_v56  ;;  %v1452_v40 = vcvt.s32.f32 %v1450_v16 }
 0x6ec   :  { %v1934_v55 = vsel %vm1930_vm4, 65537, %v2678_v39  ;;  %v2012_v48 = vmax.bf16 %v2011_v53, %v2010_v61  ;;  %v1449_v61 = vand.u32 65535, %v2871_v41  ;;  %v1556_v53 = vshrl.u32 %v2902_v28, 16 }
 0x6ed   :  { %v1939_v45 = vunpack.c.l.b16 %v1934_v55  ;;  %v1940_v4 = vunpack.c.h.b16 %v1934_v55  ;;  %vm1929_vm5 = vcmp.ne.s16.totalorder %v2358_v3, 0  ;;  %v2361_v55 = vcombine.high %v3029_v20, %v3032_v23 }
 0x6ee   :  { %2013 = vmax.xlane.bf16.xlu1 %v2012_v48  ;;  %v1933_v46 = vsel %vm1929_vm5, 65537, %v2678_v39  ;;  %v1451_v0 = vcvt.s32.f32 %v1449_v61  ;;  %v2360_v3 = vcombine.high %v1913_v44, %v3038_v56  ;;  %v1558_v48 = vcvt.s32.f32 %v1556_v53 }
 0x6ef   :  { %vm1947_vm6 = vcmp.ne.s32.totalorder %v1939_v45, 0  ;;  %v1937_v57 = vunpack.c.l.b16 %v1933_v46  ;;  %v1938_v35 = vunpack.c.h.b16 %v1933_v46  ;;  %vm1948_vm7 = vcmp.ne.s32.totalorder %v1940_v4, 0 }
 0x6f0   :  { %v1955_v63 = vsel %vm1947_vm6, 1, %v2678_v39  ;;  %v1956_v6 = vsel %vm1948_vm7, 1, %v2678_v39  ;;  %vm1932_vm10 = vcmp.ne.s16.totalorder %v2361_v55, 0  ;;  %vm1931_vm11 = vcmp.ne.s16.totalorder %v2360_v3, 0 }
 0x6f1   :  { %vm1945_vm8 = vcmp.ne.s32.totalorder %v1937_v57, 0  ;;  %vm1946_vm9 = vcmp.ne.s32.totalorder %v1938_v35, 0  ;;  %v1557_v45 = vcvt.s32.f32 %v1555_v51  ;;  %v1662_v4 = vshrl.u32 %v2933_v24, 16 }
 0x6f2   :  { %v1953_v36 = vsel %vm1945_vm8, 1, %v2678_v39  ;;  %v1954_v58 = vsel %vm1946_vm9, 1, %v2678_v39  ;;  %v1936_v41 = vsel %vm1932_vm10, 65537, %v2678_v39  ;;  %v1935_v46 = vsel %vm1931_vm11, 65537, %v2678_v39 }
 0x6f3   :  { %v1961_v47 = vadd.s32 %v1955_v63, %v1953_v36  ;;  %v1962_v49 = vadd.s32 %v1956_v6, %v1954_v58  ;;  %v1664_v57 = vcvt.s32.f32 %v1662_v4  ;;  %v1661_v35 = vand.u32 65535, %v2933_v24 }
 0x6f4   :  { %v1941_v20 = vunpack.c.l.b16 %v1935_v46  ;;  %v1942_v23 = vunpack.c.h.b16 %v1935_v46  ;;  %v1943_v56 = vunpack.c.l.b16 %v1936_v41  ;;  %v1944_v44 = vunpack.c.h.b16 %v1936_v41 }
 0x6f5   :  { %v1963_v7 = vadd.s32 %v1962_v49, %v1961_v47  ;;  %v1663_v28 = vcvt.s32.f32 %v1661_v35  ;;  %v1770_v63 = vcvt.s32.f32 %v1768_v43  ;;  %v1767_v6 = vand.u32 65535, %v2964_v27 }
 0x6f6   :  { %1125 = vadd.xlane.f32.xlu1 %v1122_v54  ;;  %vm1949_vm12 = vcmp.ne.s32.totalorder %v1941_v20, 0  ;;  %vm1950_vm13 = vcmp.ne.s32.totalorder %v1942_v23, 0  ;;  %vm1951_vm14 = vcmp.ne.s32.totalorder %v1943_v56, 0  ;;  %vm1952_vm15 = vcmp.ne.s32.totalorder %v1944_v44, 0 }
 0x6f7   :  { %v1965_v59 = vshrl.u32 %v1963_v7, 16  ;;  %v1964_v5 = vand.u32 65535, %v1963_v7  ;;  %v1957_v36 = vsel %vm1949_vm12, 1, %v2678_v39  ;;  %v1958_v24 = vsel %vm1950_vm13, 1, %v2678_v39 }
 0x6f8   :  { %v1959_v58 = vsel %vm1951_vm14, 1, %v2678_v39  ;;  %v1960_v47 = vsel %vm1952_vm15, 1, %v2678_v39  ;;  %v1769_v49 = vcvt.s32.f32 %v1767_v6  ;;  %v1874_v54 = vshrl.u32 %v2998_v14, 16 }
 0x6f9   :  { %v1967_v11 = vcvt.s32.f32 %v1965_v59  ;;  %v1966_v9 = vcvt.s32.f32 %v1964_v5  ;;  %v1976_v25 = vadd.s32 %v1959_v58, %v1957_v36  ;;  %v1977_v7 = vadd.s32 %v1960_v47, %v1958_v24 }
 0x6fa   :  { %1243 = vadd.xlane.f32.xlu1 %v1240_v60  ;;  %v1876_v59 = vcvt.s32.f32 %v1874_v54  ;;  %v1873_v60 = vand.u32 65535, %v2998_v14 }
 0x6fb   :  { %1970 = vadd.xlane.f32.xlu0 %v1967_v11  ;;  %v1978_v62 = vadd.s32 %v1977_v7, %v1976_v25 }
 0x6fc   :  { %v1875_v27 = vcvt.s32.f32 %v1873_v60 }
 0x6fd   :  { %v1980_v11 = vshrl.u32 %v1978_v62, 16 }
 0x6fe   :  { %1123 = vadd.xlane.f32.xlu1 %v1121_v12  ;;  %v1979_v12 = vand.u32 65535, %v1978_v62  ;;  %v1111_v62 = vpop.xlane.xlu0 %1110 }
 0x6ff   :  { %1968 = vadd.xlane.f32.xlu0 %v1966_v9  ;;  %v1982_v5 = vcvt.s32.f32 %v1980_v11 }
 0x700   :  { %v1981_v8 = vcvt.s32.f32 %v1979_v12 }
 0x702   :  { %1241 = vadd.xlane.f32.xlu1 %v1239_v21  ;;  %v1229_v11 = vpop.xlane.xlu0 %1228 }
 0x706   :  { %1349 = vadd.xlane.f32.xlu1 %v1346_v15  ;;  %v1109_v12 = vpop.xlane.xlu0 %1108 }
 0x70a   :  { %1347 = vadd.xlane.f32.xlu1 %v1345_v19 }
 0x70e   :  { %1455 = vadd.xlane.f32.xlu1 %v1452_v40 }
 0x712   :  { %1453 = vadd.xlane.f32.xlu1 %v1451_v0 }
 0x716   :  { %1561 = vadd.xlane.f32.xlu1 %v1558_v48 }
 0x71a   :  { %1559 = vadd.xlane.f32.xlu1 %v1557_v45 }
 0x71e   :  { %1667 = vadd.xlane.f32.xlu1 %v1664_v57 }
 0x722   :  { %1665 = vadd.xlane.f32.xlu1 %v1663_v28 }
 0x726   :  { %1773 = vadd.xlane.f32.xlu1 %v1770_v63 }
 0x72a   :  { %1771 = vadd.xlane.f32.xlu1 %v1769_v49 }
 0x72e   :  { %1879 = vadd.xlane.f32.xlu1 %v1876_v59 }
 0x732   :  { %1877 = vadd.xlane.f32.xlu1 %v1875_v27 }
 0x736   :  { %1985 = vadd.xlane.f32.xlu1 %v1982_v5 }
 0x73a   :  { %1983 = vadd.xlane.f32.xlu1 %v1981_v8 }
 0x77f   :  { %v3088_v9 = vpop.xlane.xlu1 %2013 }
 0x780   :  { %vm2015_vm0 = vcmp.eq.bf16.partialorder %v3035_v2, %v3088_v9  ;;  %vm2016_vm1 = vcmp.eq.bf16.partialorder %v3043_v37, %v3088_v9  ;;  %vm2017_vm2 = vcmp.eq.bf16.partialorder %v3046_v13, %v3088_v9  ;;  %vm2018_vm3 = vcmp.eq.bf16.partialorder %v3049_v50, %v3088_v9 }
 0x781   :  { %v2019_v14 = vsel %vm2015_vm0, 65537, %v2678_v39  ;;  %v2020_v21 = vsel %vm2016_vm1, 65537, %v2678_v39  ;;  %v2021_v10 = vsel %vm2017_vm2, 65537, %v2678_v39  ;;  %v2022_v15 = vsel %vm2018_vm3, 65537, %v2678_v39 }
 0x782   :  { %v2362_v18 = vcombine.low %v2019_v14, %v2020_v21  ;;  %v2363_v19 = vcombine.low %v2021_v10, %v2022_v15  ;;  %v2364_v2 = vcombine.high %v2019_v14, %v2020_v21  ;;  %v2365_v16 = vcombine.high %v2021_v10, %v2022_v15  ;;  %v1227_v14 = vpop.xlane.xlu0 %1226 }
 0x783   :  { %v1126_v60 = vpop.xlane.xlu1 %1125 }
 0x784   :  { %vm2037_vm4 = vcmp.ne.s16.totalorder %v2364_v2, 0  ;;  %vm2038_vm5 = vcmp.ne.s16.totalorder %v2365_v16, 0  ;;  %vm2035_vm6 = vcmp.ne.s16.totalorder %v2362_v18, 0  ;;  %vm2036_vm7 = vcmp.ne.s16.totalorder %v2363_v19, 0 }
 0x785   :  { %v2041_v37 = vsel %vm2037_vm4, 65537, %v2678_v39  ;;  %v2042_v13 = vsel %vm2038_vm5, 65537, %v2678_v39  ;;  %v2039_v50 = vsel %vm2035_vm6, 65537, %v2678_v39  ;;  %v2040_v55 = vsel %vm2036_vm7, 65537, %v2678_v39 }
 0x786   :  { %v2047_v40 = vunpack.c.l.b16 %v2041_v37  ;;  %v2048_v61 = vunpack.c.h.b16 %v2041_v37  ;;  %v2049_v0 = vunpack.c.l.b16 %v2042_v13  ;;  %v2050_v53 = vunpack.c.h.b16 %v2042_v13  ;;  %v1335_v10 = vpop.xlane.xlu0 %1334 }
 0x787   :  { %v2043_v3 = vunpack.c.l.b16 %v2039_v50  ;;  %v2044_v48 = vunpack.c.h.b16 %v2039_v50  ;;  %v2045_v46 = vunpack.c.l.b16 %v2040_v55  ;;  %v2046_v20 = vunpack.c.h.b16 %v2040_v55  ;;  %v1244_v27 = vpop.xlane.xlu1 %1243 }
 0x788   :  { %vm2055_vm8 = vcmp.ne.s32.totalorder %v2047_v40, 0  ;;  %vm2056_vm9 = vcmp.ne.s32.totalorder %v2048_v61, 0  ;;  %vm2057_vm10 = vcmp.ne.s32.totalorder %v2049_v0, 0  ;;  %vm2058_vm11 = vcmp.ne.s32.totalorder %v2050_v53, 0 }
 0x789   :  { %v2063_v51 = vsel %vm2055_vm8, 1, %v2678_v39  ;;  %v2064_v45 = vsel %vm2056_vm9, 1, %v2678_v39  ;;  %v2065_v4 = vsel %vm2057_vm10, 1, %v2678_v39  ;;  %v2066_v41 = vsel %vm2058_vm11, 1, %v2678_v39 }
 0x78a   :  { %v2082_v57 = vadd.s32 %v2065_v4, %v2063_v51  ;;  %v2083_v35 = vadd.s32 %v2066_v41, %v2064_v45  ;;  %vm2051_vm12 = vcmp.ne.s32.totalorder %v2043_v3, 0  ;;  %vm2052_vm13 = vcmp.ne.s32.totalorder %v2044_v48, 0  ;;  %v1333_v18 = vpop.xlane.xlu0 %1332 }
 0x78b   :  { %vm2053_vm14 = vcmp.ne.s32.totalorder %v2045_v46, 0  ;;  %vm2054_vm15 = vcmp.ne.s32.totalorder %v2046_v20, 0  ;;  %v2059_v56 = vsel %vm2051_vm12, 1, %v2678_v39  ;;  %v2060_v44 = vsel %vm2052_vm13, 1, %v2678_v39  ;;  %v3114_v5 = vpop.xlane.xlu1 %1123 }
 0x78c   :  { %v2084_v23 = vadd.s32 %v2083_v35, %v2082_v57  ;;  %v2061_v28 = vsel %vm2053_vm14, 1, %v2678_v39  ;;  %v2062_v43 = vsel %vm2054_vm15, 1, %v2678_v39  ;;  %v1231_v41 = vcvt.f32.s32 %v1229_v11 }
 0x78d   :  { %v2067_v6 = vadd.s32 %v2061_v28, %v2059_v56  ;;  %v2068_v36 = vadd.s32 %v2062_v43, %v2060_v44  ;;  %v1113_v46 = vcvt.f32.s32 %v1111_v62  ;;  %v1230_v57 = vcvt.f32.s32 %v1227_v14 }
 0x78e   :  { %v2086_v63 = vshrl.u32 %v2084_v23, 16  ;;  %v2085_v47 = vand.u32 65535, %v2084_v23  ;;  %v1441_v2 = vpop.xlane.xlu0 %1440  ;;  %v1337_v20 = vcvt.f32.s32 %v1335_v10  ;;  %v1232_v23 = vshll.u32 %v1231_v41, 16 }
 0x78f   :  { %v2069_v58 = vadd.s32 %v2068_v36, %v2067_v6  ;;  %v1242_v8 = vpop.xlane.xlu1 %1241  ;;  %v1112_v56 = vcvt.f32.s32 %v1109_v12  ;;  %v1336_v44 = vcvt.f32.s32 %v1333_v18  ;;  %v1443_v28 = vcvt.f32.s32 %v1441_v2 }
 0x790   :  { %v2088_v24 = vcvt.s32.f32 %v2086_v63  ;;  %v2087_v25 = vcvt.s32.f32 %v2085_v47  ;;  %v1114_v63 = vshll.u32 %v1113_v46, 16  ;;  %v1233_v6 = vadd.s32 %v1232_v23, %v1230_v57 }
 0x791   :  { %v2071_v49 = vshrl.u32 %v2069_v58, 16  ;;  %v2070_v7 = vand.u32 65535, %v2069_v58  ;;  %v1246_v36 = vcvt.f32.s32 %v1244_v27  ;;  %v1444_v11 = vshll.u32 %v1443_v28, 16 }
 0x792   :  { %2091 = vadd.xlane.f32.xlu1 %v2088_v24  ;;  %v1439_v37 = vpop.xlane.xlu0 %1438  ;;  %v1338_v24 = vshll.u32 %v1337_v20, 16  ;;  %v1127_v10 = vcvt.f32.s32 %v3114_v5 }
 0x793   :  { %v2073_v54 = vcvt.s32.f32 %v2071_v49  ;;  %v2072_v59 = vcvt.s32.f32 %v2070_v7  ;;  %v1350_v21 = vpop.xlane.xlu1 %1349  ;;  %v1442_v58 = vcvt.f32.s32 %v1439_v37  ;;  %v1128_v49 = vcvt.f32.s32 %v1126_v60 }
 0x794   :  { %v1339_v62 = vadd.s32 %v1338_v24, %v1336_v44  ;;  %v1247_v12 = vshll.u32 %v1246_v36, 16 }
 0x795   :  { %2076 = vadd.xlane.f32.xlu0 %v2073_v54  ;;  %v1245_v54 = vcvt.f32.s32 %v1242_v8  ;;  %v1445_v46 = vadd.s32 %v1444_v11, %v1442_v58  ;;  %v1129_v37 = vshll.u32 %v1128_v49, 16 }
 0x796   :  { %2089 = vadd.xlane.f32.xlu1 %v2087_v25  ;;  %v1547_v50 = vpop.xlane.xlu0 %1546  ;;  %v1352_v25 = vcvt.f32.s32 %v1350_v21 }
 0x797   :  { %v1348_v15 = vpop.xlane.xlu1 %1347  ;;  %v1549_v47 = vcvt.f32.s32 %v1547_v50  ;;  %v1248_v60 = vadd.s32 %v1247_v12, %v1245_v54  ;;  %v1130_v5 = vadd.s32 %v1129_v37, %v1127_v10 }
 0x798   :  { %v1351_v18 = vcvt.f32.s32 %v1348_v15  ;;  %v1353_v8 = vshll.u32 %v1352_v25, 16 }
 0x799   :  { %2074 = vadd.xlane.f32.xlu0 %v2072_v59  ;;  %v1115_v59 = vadd.s32 %v1114_v63, %v1112_v56  ;;  %v1550_v27 = vshll.u32 %v1549_v47, 16  ;;  %v1250_v36 = vadd.s32 %v1248_v60, %v1130_v5  ;;  %vm1132_vm3 = vcmp.ge.s32.totalorder %v1130_v5, 10 }
 0x79a   :  { %v1545_v61 = vpop.xlane.xlu0 %1544  ;;  %v1354_v15 = vadd.s32 %v1353_v8, %v1351_v18 }
 0x79b   :  { %v1456_v19 = vpop.xlane.xlu1 %1455  ;;  %v1548_v14 = vcvt.f32.s32 %v1545_v61  ;;  %v1249_v41 = vadd.s32 %v1233_v6, %v1115_v59  ;;  %vm1131_vm0 = vcmp.ge.s32.totalorder %v1115_v59, 10  ;;  %vm1252_vm4 = vcmp.ge.s32.totalorder %v1250_v36, 10 }
 0x79c   :  { %v1458_v2 = vcvt.f32.s32 %v1456_v19  ;;  %v1356_v54 = vadd.s32 %v1354_v15, %v1250_v36  ;;  %vm3161_vm5 = vmpackc.low %vm1132_vm3, %vm1131_vm0 }
 0x79d   :  { %v1355_v20 = vadd.s32 %v1339_v62, %v1249_v41  ;;  %v1551_v61 = vadd.s32 %v1550_v27, %v1548_v14  ;;  %vm1251_vm1 = vcmp.ge.s32.totalorder %v1249_v41, 10 }
 0x79e   :  { %v3124_v53 = vpop.xlane.xlu0 %1652  ;;  %v1459_v19 = vshll.u32 %v1458_v2, 16  ;;  %vm1358_vm6 = vcmp.ge.s32.totalorder %v1356_v54, 10  ;;  %vm3172_vm7 = vmpackc.low %vm1252_vm4, %vm1251_vm1 }
 0x79f   :  { %v3116_v16 = vpop.xlane.xlu1 %1453  ;;  %v1655_v23 = vcvt.f32.s32 %v3124_v53  ;;  %v1461_v28 = vadd.s32 %v1445_v46, %v1355_v20  ;;  %vm1357_vm2 = vcmp.ge.s32.totalorder %v1355_v20, 10 }
 0x7a0   :  { %v1457_v21 = vcvt.f32.s32 %v3116_v16  ;;  %vm3178_vm9 = vmpackc.low %vm1358_vm6, %vm1357_vm2 }
 0x7a1   :  { %v1567_v58 = vadd.s32 %v1551_v61, %v1461_v28  ;;  %v1656_v47 = vshll.u32 %v1655_v23, 16  ;;  %vm1463_vm11 = vcmp.ge.s32.totalorder %v1461_v28, 10  ;;  %v1360_v28 = vsel %vm3178_vm9, %v2811_v1, -3.0173155e+38 }
 0x7a2   :  { %v3128_v3 = vpop.xlane.xlu0 %1650 }
 0x7a3   :  { %v3118_v13 = vpop.xlane.xlu1 %1561  ;;  %v1654_v63 = vcvt.f32.s32 %v3128_v3  ;;  %vm1569_vm12 = vcmp.ge.s32.totalorder %v1567_v58, 10 }
 0x7a4   :  { %v1564_v50 = vcvt.f32.s32 %v3118_v13  ;;  %v1460_v13 = vadd.s32 %v1459_v19, %v1457_v21 }
 0x7a5   :  { %v1657_v62 = vadd.s32 %v1656_v47, %v1654_v63 }
 0x7a6   :  { %v3132_v51 = vpop.xlane.xlu0 %1758  ;;  %v1565_v24 = vshll.u32 %v1564_v50, 16  ;;  %v1462_v10 = vadd.s32 %v1460_v13, %v1356_v54  ;;  %v1148_v50 = vsel %vm3161_vm5, %v2743_v38, -3.0173155e+38  ;;  %v1254_v38 = vsel %vm3172_vm7, %v2780_v17, -3.0173155e+38 }
 0x7a7   :  { %v3120_v40 = vpop.xlane.xlu1 %1559  ;;  %v1673_v15 = vadd.s32 %v1657_v62, %v1567_v58 }
 0x7a8   :  { %v1563_v56 = vcvt.f32.s32 %v3120_v40  ;;  %v1761_v40 = vcvt.f32.s32 %v3132_v51  ;;  %vm1464_vm8 = vcmp.ge.s32.totalorder %v1462_v10, 10 }
 0x7a9   :  { %vm3186_vm13 = vmpackc.low %vm1464_vm8, %vm1463_vm11  ;;  %vm1675_vm0 = vcmp.ge.s32.totalorder %v1673_v15, 10 }
 0x7aa   :  { %v3136_v4 = vpop.xlane.xlu0 %1756  ;;  %v1566_v25 = vadd.s32 %v1565_v24, %v1563_v56  ;;  %v1762_v27 = vshll.u32 %v1761_v40, 16  ;;  %v1466_v40 = vsel %vm3186_vm13, %v2842_v52, -3.0173155e+38 }
 0x7ab   :  { %v3122_v0 = vpop.xlane.xlu1 %1667  ;;  %v1760_v14 = vcvt.f32.s32 %v3136_v4 }
 0x7ac   :  { %v1670_v16 = vcvt.f32.s32 %v3122_v0  ;;  %v1568_v37 = vadd.s32 %v1566_v25, %v1462_v10 }
 0x7ad   :  { %v1763_v59 = vadd.s32 %v1762_v27, %v1760_v14 }
 0x7ae   :  { %v3140_v43 = vpop.xlane.xlu0 %1864  ;;  %v1671_v3 = vshll.u32 %v1670_v16, 16  ;;  %vm1570_vm10 = vcmp.ge.s32.totalorder %v1568_v37, 10  ;;  %v2679_v16 = vmov 4284677986  }
 0x7af   :  { %v3126_v55 = vpop.xlane.xlu1 %1665  ;;  %v1867_v12 = vcvt.f32.s32 %v3140_v43  ;;  %v1149_v36 = vmax.bf16 %v2679_v16, %v1148_v50  ;;  %vm3193_vm14 = vmpackc.low %vm1570_vm10, %vm1569_vm12 }
 0x7b0   :  { %v1669_v53 = vcvt.f32.s32 %v3126_v55  ;;  %v1572_v1 = vsel %vm3193_vm14, %v2873_v42, -3.0173155e+38 }
 0x7b1   :  { %v1868_v21 = vshll.u32 %v1867_v12, 16 }
 0x7b2   :  { %v3145_v57 = vpop.xlane.xlu0 %1862  ;;  %v1672_v18 = vadd.s32 %v1671_v3, %v1669_v53 }
 0x7b3   :  { %v3130_v48 = vpop.xlane.xlu1 %1773 }
 0x7b4   :  { %v1776_v49 = vcvt.f32.s32 %v3130_v48 }
 0x7b6   :  { %v1971_v6 = vpop.xlane.xlu0 %1970  ;;  %v1777_v2 = vshll.u32 %v1776_v49, 16  ;;  %v1255_v49 = vmax.bf16 %v1254_v38, %v1149_v36 }
 0x7b7   :  { %v3134_v45 = vpop.xlane.xlu1 %1771  ;;  %v1973_v4 = vcvt.f32.s32 %v1971_v6  ;;  %v1779_v6 = vadd.s32 %v1763_v59, %v1673_v15 }
 0x7b8   :  { %v1775_v11 = vcvt.f32.s32 %v3134_v45  ;;  %v1361_v62 = vmax.bf16 %v1360_v28, %v1255_v49 }
 0x7b9   :  { %v1974_v56 = vshll.u32 %v1973_v4, 16  ;;  %vm1781_vm2 = vcmp.ge.s32.totalorder %v1779_v6, 10 }
 0x7ba   :  { %v1969_v51 = vpop.xlane.xlu0 %1968  ;;  %v1778_v43 = vadd.s32 %v1777_v2, %v1775_v11  ;;  %v1467_v52 = vmax.bf16 %v1466_v40, %v1361_v62 }
 0x7bb   :  { %v3138_v35 = vpop.xlane.xlu1 %1879  ;;  %v1972_v61 = vcvt.f32.s32 %v1969_v51 }
 0x7bc   :  { %v1882_v0 = vcvt.f32.s32 %v3138_v35  ;;  %v1866_v35 = vcvt.f32.s32 %v3145_v57  ;;  %v1674_v57 = vadd.s32 %v1672_v18, %v1568_v37  ;;  %v1573_v51 = vmax.bf16 %v1572_v1, %v1467_v52 }
 0x7bd   :  { %v1975_v13 = vadd.s32 %v1974_v56, %v1972_v61 }
 0x7be   :  { %v1883_v60 = vshll.u32 %v1882_v0, 16  ;;  %v1869_v19 = vadd.s32 %v1868_v21, %v1866_v35  ;;  %v1780_v41 = vadd.s32 %v1778_v43, %v1674_v57  ;;  %vm1676_vm15 = vcmp.ge.s32.totalorder %v1674_v57, 10 }
 0x7bf   :  { %v3142_v7 = vpop.xlane.xlu1 %1877  ;;  %vm3203_vm3 = vmpackc.low %vm1676_vm15, %vm1675_vm0 }
 0x7c0   :  { %v1881_v46 = vcvt.f32.s32 %v3142_v7  ;;  %v1885_v53 = vadd.s32 %v1869_v19, %v1779_v6  ;;  %vm1782_vm1 = vcmp.ge.s32.totalorder %v1780_v41, 10  ;;  %v1678_v42 = vsel %vm3203_vm3, %v2904_v29, -3.0173155e+38 }
 0x7c1   :  { %vm3207_vm5 = vmpackc.low %vm1782_vm1, %vm1781_vm2  ;;  %v1679_v35 = vmax.bf16 %v1678_v42, %v1573_v51 }
 0x7c2   :  { %v1884_v23 = vadd.s32 %v1883_v60, %v1881_v46  ;;  %v1991_v25 = vadd.s32 %v1975_v13, %v1885_v53  ;;  %vm1887_vm6 = vcmp.ge.s32.totalorder %v1885_v53, 10  ;;  %v1784_v2 = vsel %vm3207_vm5, %v2935_v26, -3.0173155e+38 }
 0x7c3   :  { %v1986_v44 = vpop.xlane.xlu1 %1985  ;;  %v1785_v43 = vmax.bf16 %v1784_v2, %v1679_v35 }
 0x7c4   :  { %v1988_v45 = vcvt.f32.s32 %v1986_v44  ;;  %v1886_v17 = vadd.s32 %v1884_v23, %v1780_v41  ;;  %vm1993_vm8 = vcmp.ge.s32.totalorder %v1991_v25, 10 }
 0x7c6   :  { %v1989_v5 = vshll.u32 %v1988_v45, 16  ;;  %vm1888_vm4 = vcmp.ge.s32.totalorder %v1886_v17, 10 }
 0x7c7   :  { %v1984_v55 = vpop.xlane.xlu1 %1983  ;;  %vm1889_vm9 = vmpackc.low %vm1888_vm4, %vm1887_vm6 }
 0x7c8   :  { %v1987_v8 = vcvt.f32.s32 %v1984_v55  ;;  %v1890_v4 = vsel %vm1889_vm9, %v2966_v30, -3.0173155e+38 }
 0x7ca   :  { %v1990_v63 = vadd.s32 %v1989_v5, %v1987_v8  ;;  %v1891_v8 = vmax.bf16 %v1890_v4, %v1785_v43 }
 0x7cc   :  { %v1992_v54 = vadd.s32 %v1990_v63, %v1886_v17 }
 0x7ce   :  { %vm1994_vm7 = vcmp.ge.s32.totalorder %v1992_v54, 10 }
 0x7cf   :  { %vm1995_vm10 = vmpackc.low %vm1994_vm7, %vm1993_vm8 }
 0x7d0   :  { %v1996_v29 = vsel %vm1995_vm10, %v3018_v22, -3.0173155e+38 }
 0x7d1   :  { %v1997_v59 = vmax.bf16 %v1996_v29, %v1891_v8 }
 0x81f   :  { %v2092_v24 = vpop.xlane.xlu1 %2091 }
 0x820   :  { %v2094_v58 = vcvt.f32.s32 %v2092_v24 }
 0x822   :  { %v2077_v11 = vpop.xlane.xlu0 %2076  ;;  %v2095_v14 = vshll.u32 %v2094_v58, 16 }
 0x823   :  { %v2090_v0 = vpop.xlane.xlu1 %2089  ;;  %v2079_v12 = vcvt.f32.s32 %v2077_v11 }
 0x824   :  { %v2093_v10 = vcvt.f32.s32 %v2090_v0 }
 0x825   :  { %v2080_v46 = vshll.u32 %v2079_v12, 16 }
 0x826   :  { %v2096_v48 = vadd.s32 %v2095_v14, %v2093_v10  ;;  %v2075_v18 = vpop.xlane.xlu0 %2074 }
 0x827   :  { %v2078_v27 = vcvt.f32.s32 %v2075_v18 }
 0x828   :  { %v2098_v45 = vadd.s32 %v2096_v48, %v1992_v54 }
 0x829   :  { %v2081_v37 = vadd.s32 %v2080_v46, %v2078_v27 }
 0x82a   :  { %vm2100_vm11 = vcmp.ge.s32.totalorder %v2098_v45, 10 }
 0x82b   :  { %v2097_v60 = vadd.s32 %v2081_v37, %v1991_v25 }
 0x82d   :  { %vm2099_vm12 = vcmp.ge.s32.totalorder %v2097_v60, 10 }
 0x82e   :  { %vm2101_vm13 = vmpackc.low %vm2100_vm11, %vm2099_vm12 }
 0x82f   :  { %v2102_v21 = vsel %vm2101_vm13, %v3088_v9, -3.0173155e+38 }
 0x830   :  { %v2103_v26 = vmax.bf16 %v2102_v21, %v1997_v59 }
 0x832   :  { %vm2108_vm14 = vcmp.ge.bf16.partialorder %v2731_v31, %v2103_v26  ;;  %vm2109_vm15 = vcmp.ge.bf16.partialorder %v2735_v33, %v2103_v26  ;;  %vm2110_vm0 = vcmp.ge.bf16.partialorder %v2733_v32, %v2103_v26  ;;  %vm2111_vm1 = vcmp.ge.bf16.partialorder %v2737_v34, %v2103_v26 }
 0x833   :  { %v2112_v30 = vsel %vm2108_vm14, 65537, %v2678_v39  ;;  %v2113_v22 = vsel %vm2109_vm15, 65537, %v2678_v39  ;;  %v2114_v50 = vsel %vm2110_vm0, 65537, %v2678_v39  ;;  %v2115_v61 = vsel %vm2111_vm1, 65537, %v2678_v39 }
 0x834   :  { %v2366_v7 = vcombine.low %v2112_v30, %v2113_v22  ;;  %v2367_v57 = vcombine.low %v2114_v50, %v2115_v61  ;;  %v2368_v9 = vcombine.high %v2112_v30, %v2113_v22  ;;  %v2369_v23 = vcombine.high %v2114_v50, %v2115_v61 }
 0x836   :  { %vm2128_vm2 = vcmp.ne.s16.totalorder %v2366_v7, 0  ;;  %vm2129_vm3 = vcmp.ne.s16.totalorder %v2367_v57, 0  ;;  %vm2130_vm4 = vcmp.ne.s16.totalorder %v2368_v9, 0  ;;  %vm2131_vm5 = vcmp.ne.s16.totalorder %v2369_v23, 0 }
 0x837   :  { %v2132_v31 = vsel %vm2128_vm2, 65537, %v2678_v39  ;;  %v2133_v32 = vsel %vm2129_vm3, 65537, %v2678_v39  ;;  %v2134_v33 = vsel %vm2130_vm4, 65537, %v2678_v39  ;;  %v2135_v34 = vsel %vm2131_vm5, 65537, %v2678_v39 }
 0x838   :  { %v2136_v5 = vunpack.c.l.b16 %v2132_v31  ;;  %v2137_v15 = vunpack.c.h.b16 %v2132_v31  ;;  %v2138_v19 = vunpack.c.l.b16 %v2133_v32  ;;  %v2139_v56 = vunpack.c.h.b16 %v2133_v32 }
 0x839   :  { %v2140_v44 = vunpack.c.l.b16 %v2134_v33  ;;  %v2141_v38 = vunpack.c.h.b16 %v2134_v33  ;;  %v2142_v41 = vunpack.c.l.b16 %v2135_v34  ;;  %v2143_v63 = vunpack.c.h.b16 %v2135_v34 }
 0x83a   :  { %vm2144_vm6 = vcmp.ne.s32.totalorder %v2136_v5, 0  ;;  %vm2145_vm7 = vcmp.ne.s32.totalorder %v2137_v15, 0  ;;  %vm2146_vm8 = vcmp.ne.s32.totalorder %v2138_v19, 0  ;;  %vm2147_vm9 = vcmp.ne.s32.totalorder %v2139_v56, 0 }
 0x83b   :  { %vm2148_vm10 = vcmp.ne.s32.totalorder %v2140_v44, 0  ;;  %vm2149_vm11 = vcmp.ne.s32.totalorder %v2141_v38, 0  ;;  %vm2150_vm12 = vcmp.ne.s32.totalorder %v2142_v41, 0  ;;  %vm2151_vm13 = vcmp.ne.s32.totalorder %v2143_v63, 0 }
 0x83c   :  { %v2681_v39 = vmov 0.0  }
 0x83d   :  { %v2370_v6 = vsel %vm2144_vm6, 1.0, %v2681_v39  ;;  %v2371_v16 = vsel %vm2145_vm7, 1.0, %v2681_v39  ;;  %v2372_v36 = vsel %vm2146_vm8, 1.0, %v2681_v39  ;;  %v2373_v13 = vsel %vm2147_vm9, 1.0, %v2681_v39 }
 0x83e   :  { %v2374_v20 = vsel %vm2148_vm10, 1.0, %v2681_v39  ;;  %v2375_v24 = vsel %vm2149_vm11, 1.0, %v2681_v39  ;;  %v2376_v28 = vsel %vm2150_vm12, 1.0, %v2681_v39  ;;  %v2377_v47 = vsel %vm2151_vm13, 1.0, %v2681_v39  ;;  %2168 = vst [vmem:[#allocation9] sm:$0xff] %v2370_v6  ;;  %2169 = vst [vmem:[#allocation9 + $0x8] sm:$0xff] %v2371_v16 }
 0x83f   :  { %2170 = vst [vmem:[#allocation9 + $0x10] sm:$0xff] %v2372_v36  ;;  %2171 = vst [vmem:[#allocation9 + $0x18] sm:$0xff] %v2373_v13 }
 0x840   :  { %2172 = vst [vmem:[#allocation9 + $0x20] sm:$0xff] %v2374_v20  ;;  %2173 = vst [vmem:[#allocation9 + $0x28] sm:$0xff] %v2375_v24 }
 0x841   :  { %2174 = vst [vmem:[#allocation9 + $0x30] sm:$0xff] %v2376_v28  ;;  %2175 = vst [vmem:[#allocation9 + $0x38] sm:$0xff] %v2377_v47 }
 0x842   :  { %2657 = shalt.err (!%p2654_p6)
}
 0x843   :  { %s2658_s15 = scalar_lea.hbm %s3254_s3, 1024 }
 0x844   :  { %p2659_p7 = scmp.ne.s32.totalorder %s3254_s3, %s2658_s15  ;;  %p2662_p8 = scmp.lt.u32.totalorder %s2658_s15, %s3254_s3 }
 0x846   :  { %p2664_p9 = pnand %p2662_p8, %p2659_p7 }
 0x848   :  { %2667 = shalt.err (!%p2664_p9)
}
 0x849   :  { %s2682_s20 = smov 512   ;;  %s2683_s21 = smov 32  }
 0x84a   :  { %2187 = dma.vmem_to_hbm [thread:$0]  %s3232_s11, 1024, %s3254_s3, [#allocation6], %s2682_s20, %s2682_s20, %s2683_s21  }
 0x84b   :  { %2672 = dma.done.wait [#allocation6], 1024  }
 0x84c   :  { %2673 = vsyncadd [#allocation6], 4294966272 }
 0x84d   :  { %2191 = vsyncpa [#allocation5], 1 }
 0x84e   :  { %2192 = vsyncpa [#allocation8], 1 }
 0x84f   :  { %2193 = vsyncpa [#allocation6], 1 }

</bundles_post_ra>
